<compile_context>
chip_gen: v6e
topology: v6e:2x2x1
jax: 0.10.0
libtpu: 0.0.40
codegen_flags: <defaults>
</compile_context>

<pallas_src>
import math

import jax
import jax.numpy as jnp
from jax.experimental import pallas as pl
from jax.experimental.pallas import tpu as pltpu

NUM_HEADS = 12
LN_EPS = 1e-6                       # nn.LayerNorm(..., eps=1e-06) in the module
MATMUL_DTYPE = jnp.bfloat16         # MXU-native operand dtype (f32 accumulate)
VMEM_LIMIT_BYTES = 48 * 1024 * 1024


def _round_up(x, m):
    return (x + m - 1) // m * m


def _row_tile(n_rows):
    # Largest convenient row tile: fills the MXU M dimension (256 on v6e/v7x)
    # while keeping per-step activations VMEM-friendly at ViT scale.
    return min(256, _round_up(n_rows, 8))


def _layernorm(x, gamma, beta):
    mu = jnp.mean(x, axis=-1, keepdims=True)
    xc = x - mu
    var = jnp.mean(xc * xc, axis=-1, keepdims=True)
    return xc * jax.lax.rsqrt(var + LN_EPS) * gamma + beta


def _gelu_exact(x):
    # Exact-erf GELU via Abramowitz & Stegun 7.1.26 (|err| < 1.5e-7), avoiding
    # an erf lowering inside Mosaic.  The inner divide uses the EUP approximate
    # reciprocal so the (rows, 4D) activation adds no VALU divide.
    a1, a2, a3, a4, a5 = (0.254829592, -0.284496736, 1.421413741,
                          -1.453152027, 1.061405429)
    p = 0.3275911
    z = x * (1.0 / math.sqrt(2.0))
    sgn = jnp.where(z >= 0.0, 1.0, -1.0)
    az = jnp.abs(z)
    t = pl.reciprocal(1.0 + p * az, approx=True)
    poly = ((((a5 * t + a4) * t + a3) * t + a2) * t + a1) * t
    erf = sgn * (1.0 - poly * jnp.exp(-az * az))
    return 0.5 * x * (1.0 + erf)


# ----------------------------------------------------------------------------
# Kernel 1: LayerNorm + Q/K/V projections on flattened (rows, D) activations.
# ----------------------------------------------------------------------------
def _ln_qkv_kernel(x_ref, g_ref, b_ref,
                   wq_ref, bq_ref, wk_ref, bk_ref, wv_ref, bv_ref,
                   q_ref, k_ref, v_ref):
    xn = _layernorm(x_ref[...], g_ref[...], b_ref[...]).astype(wq_ref.dtype)
    for w_ref, bias_ref, o_ref in ((wq_ref, bq_ref, q_ref),
                                   (wk_ref, bk_ref, k_ref),
                                   (wv_ref, bv_ref, v_ref)):
        y = jnp.dot(xn, w_ref[...], preferred_element_type=jnp.float32)
        o_ref[...] = (y + bias_ref[...]).astype(o_ref.dtype)


def _ln_qkv(x_rows, g1, b1, wq, bq, wk, bk, wv, bv, *, rt):
    n, d = x_rows.shape
    row = lambda r: (r, 0)
    const = lambda r: (0, 0)
    row_spec = pl.BlockSpec((rt, d), row)
    out_spec = pl.BlockSpec((rt, d), row)
    w_specs = [pl.BlockSpec(p.shape, const)
               for p in (g1, b1, wq, bq, wk, bk, wv, bv)]
    qkv_shape = jax.ShapeDtypeStruct((n, d), wq.dtype)
    return pl.pallas_call(
        _ln_qkv_kernel,
        out_shape=(qkv_shape, qkv_shape, qkv_shape),
        grid_spec=pltpu.PrefetchScalarGridSpec(
            num_scalar_prefetch=0,
            grid=(n // rt,),
            in_specs=[row_spec] + w_specs,
            out_specs=(out_spec, out_spec, out_spec)),
        compiler_params=pltpu.CompilerParams(
            dimension_semantics=("parallel",),
            vmem_limit_bytes=VMEM_LIMIT_BYTES),
    )(x_rows, g1, b1, wq, bq, wk, bk, wv, bv)


# ----------------------------------------------------------------------------
# Kernel 2: head-batched attention for one batch element per grid step.
# ----------------------------------------------------------------------------
def _mha_kernel(q_ref, k_ref, v_ref, ctx_ref, attn_ref):
    q = q_ref[...]                                     # (H, L, Dh) bf16
    k = k_ref[...]
    v = v_ref[...]
    scale = 1.0 / math.sqrt(q.shape[-1])
    s = jnp.einsum("hqd,hkd->hqk", q, k,
                   preferred_element_type=jnp.float32) * scale
    s = s - jnp.max(s, axis=-1, keepdims=True)
    e = jnp.exp(s)
    p = e / jnp.sum(e, axis=-1, keepdims=True)          # (H, L, L) f32
    attn_ref[...] = (jnp.sum(p, axis=0) *
                     (1.0 / p.shape[0])).astype(attn_ref.dtype)
    ctx = jnp.einsum("hqk,hkd->hqd", p.astype(v.dtype), v,
                     preferred_element_type=jnp.float32)
    ctx_ref[...] = ctx.astype(ctx_ref.dtype)


def _mha(q4, k4, v4):
    b, h, l, dh = q4.shape
    qkv_spec = pl.BlockSpec((None, h, l, dh), lambda i: (i, 0, 0, 0))
    ctx_spec = pl.BlockSpec((None, h, l, dh), lambda i: (i, 0, 0, 0))
    attn_spec = pl.BlockSpec((None, l, l), lambda i: (i, 0, 0))
    return pl.pallas_call(
        _mha_kernel,
        out_shape=(jax.ShapeDtypeStruct((b, h, l, dh), q4.dtype),
                   jax.ShapeDtypeStruct((b, l, l), jnp.float32)),
        grid_spec=pltpu.PrefetchScalarGridSpec(
            num_scalar_prefetch=0,
            grid=(b,),
            in_specs=[qkv_spec, qkv_spec, qkv_spec],
            out_specs=(ctx_spec, attn_spec)),
        compiler_params=pltpu.CompilerParams(
            dimension_semantics=("parallel",),
            vmem_limit_bytes=VMEM_LIMIT_BYTES),
    )(q4, k4, v4)


# ----------------------------------------------------------------------------
# Kernel 3: out-proj + residual + LayerNorm + MLP(4x, GELU) + residual.
# ----------------------------------------------------------------------------
def _proj_mlp_kernel(ctx_ref, x_ref, wo_ref, bo_ref, g_ref, b_ref,
                     w1_ref, b1_ref, w2_ref, b2_ref, out_ref):
    attn_out = jnp.dot(ctx_ref[...], wo_ref[...],
                       preferred_element_type=jnp.float32) + bo_ref[...]
    x1 = attn_out + x_ref[...]
    xn = _layernorm(x1, g_ref[...], b_ref[...]).astype(w1_ref.dtype)
    hid = jnp.dot(xn, w1_ref[...],
                  preferred_element_type=jnp.float32) + b1_ref[...]
    hid = _gelu_exact(hid).astype(w2_ref.dtype)
    y = jnp.dot(hid, w2_ref[...],
                preferred_element_type=jnp.float32) + b2_ref[...]
    out_ref[...] = (y + x1).astype(out_ref.dtype)


def _proj_mlp(ctx_rows, x_rows, wo, bo, g2, b2, w1, bi1, w2, bi2, *, rt):
    n, d = x_rows.shape
    row = lambda r: (r, 0)
    const = lambda r: (0, 0)
    ctx_spec = pl.BlockSpec((rt, d), row)
    x_spec = pl.BlockSpec((rt, d), row)
    w_specs = [pl.BlockSpec(p.shape, const)
               for p in (wo, bo, g2, b2, w1, bi1, w2, bi2)]
    return pl.pallas_call(
        _proj_mlp_kernel,
        out_shape=jax.ShapeDtypeStruct((n, d), jnp.float32),
        grid_spec=pltpu.PrefetchScalarGridSpec(
            num_scalar_prefetch=0,
            grid=(n // rt,),
            in_specs=[ctx_spec, x_spec] + w_specs,
            out_specs=pl.BlockSpec((rt, d), row)),
        compiler_params=pltpu.CompilerParams(
            dimension_semantics=("parallel",),
            vmem_limit_bytes=VMEM_LIMIT_BYTES),
    )(ctx_rows, x_rows, wo, bo, g2, b2, w1, bi1, w2, bi2)


@jax.jit
def block_forward(x, params):
    """x: (B, L, D) float32.  params: tuple of 16 arrays (see make_params)."""
    (g1, b1, wq, bq, wk, bk, wv, bv,
     wo, bo, g2, b2, w1, bi1, w2, bi2) = params
    B, L, D = x.shape
    H = NUM_HEADS
    assert D % H == 0
    Dh = D // H

    n = B * L
    rt = _row_tile(n)
    n_pad = _round_up(n, rt)

    x_rows = x.reshape(n, D)
    x_rows_p = jnp.pad(x_rows, ((0, n_pad - n), (0, 0)))

    # LN + QKV projections on (rows, D) in bf16.
    q, k, v = _ln_qkv(x_rows_p, g1, b1, wq, bq, wk, bk, wv, bv, rt=rt)

    # XLA-side layout shuffle to head-major (cheap, keeps the kernel free of
    # unsupported middle-dim transposes).
    def to_heads(t):
        return t[:n].reshape(B, L, H, Dh).transpose(0, 2, 1, 3)

    ctx4, attn = _mha(to_heads(q), to_heads(k), to_heads(v))

    ctx_rows = ctx4.transpose(0, 2, 1, 3).reshape(n, D)
    ctx_rows_p = jnp.pad(ctx_rows, ((0, n_pad - n), (0, 0)))

    out_rows = _proj_mlp(ctx_rows_p, x_rows_p, wo, bo, g2, b2,
                         w1, bi1, w2, bi2, rt=rt)
    return out_rows[:n].reshape(B, L, D), attn


def make_params(key, D):
    """Deterministic synthetic parameters matching Block(vis, out_channels=D).

    Matmul weights are pre-transposed to (in, out) and cast to MATMUL_DTYPE
    (bf16, f32 accumulation in-kernel); biases and LayerNorm params stay f32.
    """
    ks = jax.random.split(key, 6)

    def xavier(k, shape):  # (out, in) fan convention like nn.init.xavier_uniform_
        fan_out, fan_in = shape
        bound = math.sqrt(6.0 / (fan_in + fan_out))
        return jax.random.uniform(k, shape, jnp.float32, -bound, bound)

    # LayerNorms
    g1 = jnp.ones((1, D), jnp.float32)
    b1 = jnp.zeros((1, D), jnp.float32)
    g2 = jnp.ones((1, D), jnp.float32)
    b2 = jnp.zeros((1, D), jnp.float32)

    # MultiheadAttention: in_proj (3D, D) xavier, biases 0; out_proj ~ Linear
    # default weight, bias 0.  Split in_proj into Wq/Wk/Wv (lane alignment).
    in_proj = xavier(ks[0], (3 * D, D))
    wq_t, wk_t, wv_t = in_proj[0:D], in_proj[D:2 * D], in_proj[2 * D:3 * D]
    bq = jnp.zeros((1, D), jnp.float32)
    bk = jnp.zeros((1, D), jnp.float32)
    bv = jnp.zeros((1, D), jnp.float32)
    wo_t = jax.random.uniform(ks[1], (D, D), jnp.float32,
                              -1.0 / math.sqrt(D), 1.0 / math.sqrt(D))
    bo = jnp.zeros((1, D), jnp.float32)

    # Mlp: fc1 (4D, D) xavier, fc2 (D, 4D) xavier, biases ~ N(0, 1e-6)
    w1_t = xavier(ks[2], (4 * D, D))
    bi1 = 1e-6 * jax.random.normal(ks[3], (1, 4 * D), jnp.float32)
    w2_t = xavier(ks[4], (D, 4 * D))
    bi2 = 1e-6 * jax.random.normal(ks[5], (1, D), jnp.float32)

    mm = lambda w: w.T.astype(MATMUL_DTYPE)   # pre-transpose to (in, out)
    return (g1, b1,
            mm(wq_t), bq, mm(wk_t), bk, mm(wv_t), bv,
            mm(wo_t), bo,
            g2, b2,
            mm(w1_t), bi1, mm(w2_t), bi2)


if __name__ == "__main__":
    B, L, D = 2, 8, 96          # D must be divisible by 12 heads
    key = jax.random.PRNGKey(0)
    kx, kp = jax.random.split(key)
    x = jax.random.normal(kx, (B, L, D), jnp.float32)
    params = make_params(kp, D)

    out, attn_weights = jax.block_until_ready(block_forward(x, params))
    assert out.shape == (B, L, D)
    assert attn_weights.shape == (B, L, L)
    assert bool(jnp.all(jnp.isfinite(out)))
    assert bool(jnp.all(jnp.isfinite(attn_weights)))
    print("KERNEL_OK")
</pallas_src>

<mosaic_0001>
module attributes {stable_mosaic.version = 11 : i64} {
  func.func @_ln_qkv_kernel(%arg0: i32, %arg1: memref<16x96xf32, #tpu.memory_space<vmem>>, %arg2: memref<1x96xf32, #tpu.memory_space<vmem>>, %arg3: memref<1x96xf32, #tpu.memory_space<vmem>>, %arg4: memref<96x96xbf16, #tpu.memory_space<vmem>>, %arg5: memref<1x96xf32, #tpu.memory_space<vmem>>, %arg6: memref<96x96xbf16, #tpu.memory_space<vmem>>, %arg7: memref<1x96xf32, #tpu.memory_space<vmem>>, %arg8: memref<96x96xbf16, #tpu.memory_space<vmem>>, %arg9: memref<1x96xf32, #tpu.memory_space<vmem>>, %arg10: memref<16x96xbf16, #tpu.memory_space<vmem>>, %arg11: memref<16x96xbf16, #tpu.memory_space<vmem>>, %arg12: memref<16x96xbf16, #tpu.memory_space<vmem>>) attributes {dimension_semantics = [#tpu.dimension_semantics<parallel>], iteration_bounds = array<i64: 1>, scalar_prefetch = 0 : i64, scratch_operands = 0 : i64, tpu.core_type = #tpu.core_type<tc>, window_params = [{transform_indices = @transform_0, window_bounds = array<i64: 16, 96>}, {pipeline_mode = #tpu.pipeline_mode<synchronous>, transform_indices = @transform_1, window_bounds = array<i64: 1, 96>}, {pipeline_mode = #tpu.pipeline_mode<synchronous>, transform_indices = @transform_2, window_bounds = array<i64: 1, 96>}, {pipeline_mode = #tpu.pipeline_mode<synchronous>, transform_indices = @transform_3, window_bounds = array<i64: 96, 96>}, {pipeline_mode = #tpu.pipeline_mode<synchronous>, transform_indices = @transform_4, window_bounds = array<i64: 1, 96>}, {pipeline_mode = #tpu.pipeline_mode<synchronous>, transform_indices = @transform_5, window_bounds = array<i64: 96, 96>}, {pipeline_mode = #tpu.pipeline_mode<synchronous>, transform_indices = @transform_6, window_bounds = array<i64: 1, 96>}, {pipeline_mode = #tpu.pipeline_mode<synchronous>, transform_indices = @transform_7, window_bounds = array<i64: 96, 96>}, {pipeline_mode = #tpu.pipeline_mode<synchronous>, transform_indices = @transform_8, window_bounds = array<i64: 1, 96>}, {transform_indices = @transform_9, window_bounds = array<i64: 16, 96>}, {transform_indices = @transform_10, window_bounds = array<i64: 16, 96>}, {transform_indices = @transform_11, window_bounds = array<i64: 16, 96>}]} {
    %c0 = arith.constant 0 : index
    %c0_0 = arith.constant 0 : index
    %0 = vector.load %arg1[%c0, %c0_0] : memref<16x96xf32, #tpu.memory_space<vmem>>, vector<16x96xf32>
    %c0_1 = arith.constant 0 : index
    %c0_2 = arith.constant 0 : index
    %1 = vector.load %arg2[%c0_1, %c0_2] : memref<1x96xf32, #tpu.memory_space<vmem>>, vector<1x96xf32>
    %c0_3 = arith.constant 0 : index
    %c0_4 = arith.constant 0 : index
    %2 = vector.load %arg3[%c0_3, %c0_4] : memref<1x96xf32, #tpu.memory_space<vmem>>, vector<1x96xf32>
    %cst = arith.constant dense<0.000000e+00> : vector<16xf32>
    %3 = vector.multi_reduction <add>, %0, %cst [1] : vector<16x96xf32> to vector<16xf32>
    %4 = vector.shape_cast %3 : vector<16xf32> to vector<16x1xf32>
    %cst_5 = arith.constant 9.600000e+01 : f32
    %5 = vector.broadcast %cst_5 : f32 to vector<16x1xf32>
    %6 = arith.divf %4, %5 : vector<16x1xf32>
    %7 = vector.broadcast %6 : vector<16x1xf32> to vector<16x96xf32>
    %8 = arith.subf %0, %7 : vector<16x96xf32>
    %9 = arith.mulf %8, %8 : vector<16x96xf32>
    %cst_6 = arith.constant dense<0.000000e+00> : vector<16xf32>
    %10 = vector.multi_reduction <add>, %9, %cst_6 [1] : vector<16x96xf32> to vector<16xf32>
    %11 = vector.shape_cast %10 : vector<16xf32> to vector<16x1xf32>
    %cst_7 = arith.constant 9.600000e+01 : f32
    %12 = vector.broadcast %cst_7 : f32 to vector<16x1xf32>
    %13 = arith.divf %11, %12 : vector<16x1xf32>
    %cst_8 = arith.constant 9.99999997E-7 : f32
    %14 = vector.broadcast %cst_8 : f32 to vector<16x1xf32>
    %15 = arith.addf %13, %14 : vector<16x1xf32>
    %16 = math.rsqrt %15 : vector<16x1xf32>
    %17 = vector.broadcast %16 : vector<16x1xf32> to vector<16x96xf32>
    %18 = arith.mulf %8, %17 : vector<16x96xf32>
    %19 = vector.broadcast %1 : vector<1x96xf32> to vector<16x96xf32>
    %20 = arith.mulf %18, %19 : vector<16x96xf32>
    %21 = vector.broadcast %2 : vector<1x96xf32> to vector<16x96xf32>
    %22 = arith.addf %20, %21 : vector<16x96xf32>
    %23 = arith.truncf %22 : vector<16x96xf32> to vector<16x96xbf16>
    %c0_9 = arith.constant 0 : index
    %c0_10 = arith.constant 0 : index
    %24 = vector.load %arg4[%c0_9, %c0_10] : memref<96x96xbf16, #tpu.memory_space<vmem>>, vector<96x96xbf16>
    %cst_11 = arith.constant dense<0.000000e+00> : vector<16x96xf32>
    %25 = tpu.matmul %23, %24, %cst_11 {dimension_numbers = #tpu.dot_dimension_numbers<[1], [0], [0], [1], [0, 0, 1, 1], [], []>} : vector<16x96xbf16>, vector<96x96xbf16>, vector<16x96xf32> -> vector<16x96xf32>
    %c0_12 = arith.constant 0 : index
    %c0_13 = arith.constant 0 : index
    %26 = vector.load %arg5[%c0_12, %c0_13] : memref<1x96xf32, #tpu.memory_space<vmem>>, vector<1x96xf32>
    %27 = vector.broadcast %26 : vector<1x96xf32> to vector<16x96xf32>
    %28 = arith.addf %25, %27 : vector<16x96xf32>
    %29 = arith.truncf %28 : vector<16x96xf32> to vector<16x96xbf16>
    %c0_14 = arith.constant 0 : index
    %c0_15 = arith.constant 0 : index
    %30 = vector.load %arg10[%c0_14, %c0_15] : memref<16x96xbf16, #tpu.memory_space<vmem>>, vector<16x96xbf16>
    tpu.vector_store %arg10[%c0_14, %c0_15], %29 {strides = array<i32>} : memref<16x96xbf16, #tpu.memory_space<vmem>>, vector<16x96xbf16>,
    %c0_16 = arith.constant 0 : index
    %c0_17 = arith.constant 0 : index
    %31 = vector.load %arg6[%c0_16, %c0_17] : memref<96x96xbf16, #tpu.memory_space<vmem>>, vector<96x96xbf16>
    %cst_18 = arith.constant dense<0.000000e+00> : vector<16x96xf32>
    %32 = tpu.matmul %23, %31, %cst_18 {dimension_numbers = #tpu.dot_dimension_numbers<[1], [0], [0], [1], [0, 0, 1, 1], [], []>} : vector<16x96xbf16>, vector<96x96xbf16>, vector<16x96xf32> -> vector<16x96xf32>
    %c0_19 = arith.constant 0 : index
    %c0_20 = arith.constant 0 : index
    %33 = vector.load %arg7[%c0_19, %c0_20] : memref<1x96xf32, #tpu.memory_space<vmem>>, vector<1x96xf32>
    %34 = vector.broadcast %33 : vector<1x96xf32> to vector<16x96xf32>
    %35 = arith.addf %32, %34 : vector<16x96xf32>
    %36 = arith.truncf %35 : vector<16x96xf32> to vector<16x96xbf16>
    %c0_21 = arith.constant 0 : index
    %c0_22 = arith.constant 0 : index
    %37 = vector.load %arg11[%c0_21, %c0_22] : memref<16x96xbf16, #tpu.memory_space<vmem>>, vector<16x96xbf16>
    tpu.vector_store %arg11[%c0_21, %c0_22], %36 {strides = array<i32>} : memref<16x96xbf16, #tpu.memory_space<vmem>>, vector<16x96xbf16>,
    %c0_23 = arith.constant 0 : index
    %c0_24 = arith.constant 0 : index
    %38 = vector.load %arg8[%c0_23, %c0_24] : memref<96x96xbf16, #tpu.memory_space<vmem>>, vector<96x96xbf16>
    %cst_25 = arith.constant dense<0.000000e+00> : vector<16x96xf32>
    %39 = tpu.matmul %23, %38, %cst_25 {dimension_numbers = #tpu.dot_dimension_numbers<[1], [0], [0], [1], [0, 0, 1, 1], [], []>} : vector<16x96xbf16>, vector<96x96xbf16>, vector<16x96xf32> -> vector<16x96xf32>
    %c0_26 = arith.constant 0 : index
    %c0_27 = arith.constant 0 : index
    %40 = vector.load %arg9[%c0_26, %c0_27] : memref<1x96xf32, #tpu.memory_space<vmem>>, vector<1x96xf32>
    %41 = vector.broadcast %40 : vector<1x96xf32> to vector<16x96xf32>
    %42 = arith.addf %39, %41 : vector<16x96xf32>
    %43 = arith.truncf %42 : vector<16x96xf32> to vector<16x96xbf16>
    %c0_28 = arith.constant 0 : index
    %c0_29 = arith.constant 0 : index
    %44 = vector.load %arg12[%c0_28, %c0_29] : memref<16x96xbf16, #tpu.memory_space<vmem>>, vector<16x96xbf16>
    tpu.vector_store %arg12[%c0_28, %c0_29], %43 {strides = array<i32>} : memref<16x96xbf16, #tpu.memory_space<vmem>>, vector<16x96xbf16>,
    return
  }
  func.func @transform_0(%arg0: i32) -> (i32, i32) {
    %c0_i32 = arith.constant 0 : i32
    %c0_i32_0 = arith.constant 0 : i32
    return %arg0, %c0_i32 : i32, i32
  }
  func.func @transform_1(%arg0: i32) -> (i32, i32) {
    %c0_i32 = arith.constant 0 : i32
    %c0_i32_0 = arith.constant 0 : i32
    %c0_i32_1 = arith.constant 0 : i32
    return %c0_i32, %c0_i32_0 : i32, i32
  }
  func.func @transform_2(%arg0: i32) -> (i32, i32) {
    %c0_i32 = arith.constant 0 : i32
    %c0_i32_0 = arith.constant 0 : i32
    %c0_i32_1 = arith.constant 0 : i32
    return %c0_i32, %c0_i32_0 : i32, i32
  }
  func.func @transform_3(%arg0: i32) -> (i32, i32) {
    %c0_i32 = arith.constant 0 : i32
    %c0_i32_0 = arith.constant 0 : i32
    %c0_i32_1 = arith.constant 0 : i32
    return %c0_i32, %c0_i32_0 : i32, i32
  }
  func.func @transform_4(%arg0: i32) -> (i32, i32) {
    %c0_i32 = arith.constant 0 : i32
    %c0_i32_0 = arith.constant 0 : i32
    %c0_i32_1 = arith.constant 0 : i32
    return %c0_i32, %c0_i32_0 : i32, i32
  }
  func.func @transform_5(%arg0: i32) -> (i32, i32) {
    %c0_i32 = arith.constant 0 : i32
    %c0_i32_0 = arith.constant 0 : i32
    %c0_i32_1 = arith.constant 0 : i32
    return %c0_i32, %c0_i32_0 : i32, i32
  }
  func.func @transform_6(%arg0: i32) -> (i32, i32) {
    %c0_i32 = arith.constant 0 : i32
    %c0_i32_0 = arith.constant 0 : i32
    %c0_i32_1 = arith.constant 0 : i32
    return %c0_i32, %c0_i32_0 : i32, i32
  }
  func.func @transform_7(%arg0: i32) -> (i32, i32) {
    %c0_i32 = arith.constant 0 : i32
    %c0_i32_0 = arith.constant 0 : i32
    %c0_i32_1 = arith.constant 0 : i32
    return %c0_i32, %c0_i32_0 : i32, i32
  }
  func.func @transform_8(%arg0: i32) -> (i32, i32) {
    %c0_i32 = arith.constant 0 : i32
    %c0_i32_0 = arith.constant 0 : i32
    %c0_i32_1 = arith.constant 0 : i32
    return %c0_i32, %c0_i32_0 : i32, i32
  }
  func.func @transform_9(%arg0: i32) -> (i32, i32) {
    %c0_i32 = arith.constant 0 : i32
    %c0_i32_0 = arith.constant 0 : i32
    return %arg0, %c0_i32 : i32, i32
  }
  func.func @transform_10(%arg0: i32) -> (i32, i32) {
    %c0_i32 = arith.constant 0 : i32
    %c0_i32_0 = arith.constant 0 : i32
    return %arg0, %c0_i32 : i32, i32
  }
  func.func @transform_11(%arg0: i32) -> (i32, i32) {
    %c0_i32 = arith.constant 0 : i32
    %c0_i32_0 = arith.constant 0 : i32
    return %arg0, %c0_i32 : i32, i32
  }
}

module attributes {stable_mosaic.version = 11 : i64} {
  func.func @_mha_kernel(%arg0: i32, %arg1: memref<1x12x8x8xbf16, #tpu.memory_space<vmem>>, %arg2: memref<1x12x8x8xbf16, #tpu.memory_space<vmem>>, %arg3: memref<1x12x8x8xbf16, #tpu.memory_space<vmem>>, %arg4: memref<1x12x8x8xbf16, #tpu.memory_space<vmem>>, %arg5: memref<1x8x8xf32, #tpu.memory_space<vmem>>) attributes {dimension_semantics = [#tpu.dimension_semantics<parallel>], iteration_bounds = array<i64: 2>, scalar_prefetch = 0 : i64, scratch_operands = 0 : i64, tpu.core_type = #tpu.core_type<tc>, window_params = [{transform_indices = @transform_0, window_bounds = array<i64: 1, 12, 8, 8>}, {transform_indices = @transform_1, window_bounds = array<i64: 1, 12, 8, 8>}, {transform_indices = @transform_2, window_bounds = array<i64: 1, 12, 8, 8>}, {transform_indices = @transform_3, window_bounds = array<i64: 1, 12, 8, 8>}, {transform_indices = @transform_4, window_bounds = array<i64: 1, 8, 8>}]} {
    %c0 = arith.constant 0 : index
    %c0_0 = arith.constant 0 : index
    %c0_1 = arith.constant 0 : index
    %c0_2 = arith.constant 0 : index
    %0 = vector.load %arg1[%c0, %c0_0, %c0_1, %c0_2] : memref<1x12x8x8xbf16, #tpu.memory_space<vmem>>, vector<1x12x8x8xbf16>
    %1 = vector.shape_cast %0 : vector<1x12x8x8xbf16> to vector<12x8x8xbf16>
    %c0_3 = arith.constant 0 : index
    %c0_4 = arith.constant 0 : index
    %c0_5 = arith.constant 0 : index
    %c0_6 = arith.constant 0 : index
    %2 = vector.load %arg2[%c0_3, %c0_4, %c0_5, %c0_6] : memref<1x12x8x8xbf16, #tpu.memory_space<vmem>>, vector<1x12x8x8xbf16>
    %3 = vector.shape_cast %2 : vector<1x12x8x8xbf16> to vector<12x8x8xbf16>
    %c0_7 = arith.constant 0 : index
    %c0_8 = arith.constant 0 : index
    %c0_9 = arith.constant 0 : index
    %c0_10 = arith.constant 0 : index
    %4 = vector.load %arg3[%c0_7, %c0_8, %c0_9, %c0_10] : memref<1x12x8x8xbf16, #tpu.memory_space<vmem>>, vector<1x12x8x8xbf16>
    %5 = vector.shape_cast %4 : vector<1x12x8x8xbf16> to vector<12x8x8xbf16>
    "tpu.trace_start"() <{level = 10 : i32, message = "hqd,hkd->hqk"}> : () -> ()
    %cst = arith.constant dense<0.000000e+00> : vector<12x8x8xf32>
    %6 = tpu.matmul %1, %3, %cst {dimension_numbers = #tpu.dot_dimension_numbers<[2], [2], [1], [1], [0, 0, 0, 1, 1, 1], [0], [0]>} : vector<12x8x8xbf16>, vector<12x8x8xbf16>, vector<12x8x8xf32> -> vector<12x8x8xf32>
    "tpu.trace_stop"() : () -> ()
    %cst_11 = arith.constant 0.353553385 : f32
    %7 = vector.broadcast %cst_11 : f32 to vector<12x8x8xf32>
    %8 = arith.mulf %6, %7 : vector<12x8x8xf32>
    %cst_12 = arith.constant dense<0xFF800000> : vector<12x8xf32>
    %9 = vector.multi_reduction <maximumf>, %8, %cst_12 [2] : vector<12x8x8xf32> to vector<12x8xf32>
    %10 = vector.shape_cast %9 : vector<12x8xf32> to vector<12x8x1xf32>
    %11 = vector.broadcast %10 : vector<12x8x1xf32> to vector<12x8x8xf32>
    %12 = arith.subf %8, %11 : vector<12x8x8xf32>
    %13 = math.exp %12 : vector<12x8x8xf32>
    %cst_13 = arith.constant dense<0.000000e+00> : vector<12x8xf32>
    %14 = vector.multi_reduction <add>, %13, %cst_13 [2] : vector<12x8x8xf32> to vector<12x8xf32>
    %15 = vector.shape_cast %14 : vector<12x8xf32> to vector<12x8x1xf32>
    %16 = vector.broadcast %15 : vector<12x8x1xf32> to vector<12x8x8xf32>
    %17 = arith.divf %13, %16 : vector<12x8x8xf32>
    %cst_14 = arith.constant dense<0.000000e+00> : vector<8x8xf32>
    %18 = vector.multi_reduction <add>, %17, %cst_14 [0] : vector<12x8x8xf32> to vector<8x8xf32>
    %cst_15 = arith.constant 0.0833333358 : f32
    %19 = vector.broadcast %cst_15 : f32 to vector<8x8xf32>
    %20 = arith.mulf %18, %19 : vector<8x8xf32>
    %c0_16 = arith.constant 0 : index
    %c0_17 = arith.constant 0 : index
    %c0_18 = arith.constant 0 : index
    %21 = vector.load %arg5[%c0_16, %c0_17, %c0_18] : memref<1x8x8xf32, #tpu.memory_space<vmem>>, vector<1x8x8xf32>
    %22 = vector.shape_cast %21 : vector<1x8x8xf32> to vector<8x8xf32>
    %23 = vector.shape_cast %20 : vector<8x8xf32> to vector<1x8x8xf32>
    tpu.vector_store %arg5[%c0_16, %c0_17, %c0_18], %23 {strides = array<i32>} : memref<1x8x8xf32, #tpu.memory_space<vmem>>, vector<1x8x8xf32>,
    %24 = arith.truncf %17 : vector<12x8x8xf32> to vector<12x8x8xbf16>
    "tpu.trace_start"() <{level = 10 : i32, message = "hqk,hkd->hqd"}> : () -> ()
    %cst_19 = arith.constant dense<0.000000e+00> : vector<12x8x8xf32>
    %25 = tpu.matmul %24, %5, %cst_19 {dimension_numbers = #tpu.dot_dimension_numbers<[2], [1], [1], [2], [0, 0, 0, 1, 1, 2], [0], [0]>} : vector<12x8x8xbf16>, vector<12x8x8xbf16>, vector<12x8x8xf32> -> vector<12x8x8xf32>
    "tpu.trace_stop"() : () -> ()
    %26 = arith.truncf %25 : vector<12x8x8xf32> to vector<12x8x8xbf16>
    %c0_20 = arith.constant 0 : index
    %c0_21 = arith.constant 0 : index
    %c0_22 = arith.constant 0 : index
    %c0_23 = arith.constant 0 : index
    %27 = vector.load %arg4[%c0_20, %c0_21, %c0_22, %c0_23] : memref<1x12x8x8xbf16, #tpu.memory_space<vmem>>, vector<1x12x8x8xbf16>
    %28 = vector.shape_cast %27 : vector<1x12x8x8xbf16> to vector<12x8x8xbf16>
    %29 = vector.shape_cast %26 : vector<12x8x8xbf16> to vector<1x12x8x8xbf16>
    tpu.vector_store %arg4[%c0_20, %c0_21, %c0_22, %c0_23], %29 {strides = array<i32>} : memref<1x12x8x8xbf16, #tpu.memory_space<vmem>>, vector<1x12x8x8xbf16>,
    return
  }
  func.func @transform_0(%arg0: i32) -> (i32, i32, i32, i32) {
    %c0_i32 = arith.constant 0 : i32
    %c0_i32_0 = arith.constant 0 : i32
    %c0_i32_1 = arith.constant 0 : i32
    %c0_i32_2 = arith.constant 0 : i32
    return %arg0, %c0_i32, %c0_i32_0, %c0_i32_1 : i32, i32, i32, i32
  }
  func.func @transform_1(%arg0: i32) -> (i32, i32, i32, i32) {
    %c0_i32 = arith.constant 0 : i32
    %c0_i32_0 = arith.constant 0 : i32
    %c0_i32_1 = arith.constant 0 : i32
    %c0_i32_2 = arith.constant 0 : i32
    return %arg0, %c0_i32, %c0_i32_0, %c0_i32_1 : i32, i32, i32, i32
  }
  func.func @transform_2(%arg0: i32) -> (i32, i32, i32, i32) {
    %c0_i32 = arith.constant 0 : i32
    %c0_i32_0 = arith.constant 0 : i32
    %c0_i32_1 = arith.constant 0 : i32
    %c0_i32_2 = arith.constant 0 : i32
    return %arg0, %c0_i32, %c0_i32_0, %c0_i32_1 : i32, i32, i32, i32
  }
  func.func @transform_3(%arg0: i32) -> (i32, i32, i32, i32) {
    %c0_i32 = arith.constant 0 : i32
    %c0_i32_0 = arith.constant 0 : i32
    %c0_i32_1 = arith.constant 0 : i32
    %c0_i32_2 = arith.constant 0 : i32
    return %arg0, %c0_i32, %c0_i32_0, %c0_i32_1 : i32, i32, i32, i32
  }
  func.func @transform_4(%arg0: i32) -> (i32, i32, i32) {
    %c0_i32 = arith.constant 0 : i32
    %c0_i32_0 = arith.constant 0 : i32
    %c0_i32_1 = arith.constant 0 : i32
    return %arg0, %c0_i32, %c0_i32_0 : i32, i32, i32
  }
}

module attributes {stable_mosaic.version = 11 : i64} {
  func.func @_proj_mlp_kernel(%arg0: i32, %arg1: memref<16x96xbf16, #tpu.memory_space<vmem>>, %arg2: memref<16x96xf32, #tpu.memory_space<vmem>>, %arg3: memref<96x96xbf16, #tpu.memory_space<vmem>>, %arg4: memref<1x96xf32, #tpu.memory_space<vmem>>, %arg5: memref<1x96xf32, #tpu.memory_space<vmem>>, %arg6: memref<1x96xf32, #tpu.memory_space<vmem>>, %arg7: memref<96x384xbf16, #tpu.memory_space<vmem>>, %arg8: memref<1x384xf32, #tpu.memory_space<vmem>>, %arg9: memref<384x96xbf16, #tpu.memory_space<vmem>>, %arg10: memref<1x96xf32, #tpu.memory_space<vmem>>, %arg11: memref<16x96xf32, #tpu.memory_space<vmem>>) attributes {dimension_semantics = [#tpu.dimension_semantics<parallel>], iteration_bounds = array<i64: 1>, scalar_prefetch = 0 : i64, scratch_operands = 0 : i64, tpu.core_type = #tpu.core_type<tc>, window_params = [{transform_indices = @transform_0, window_bounds = array<i64: 16, 96>}, {transform_indices = @transform_1, window_bounds = array<i64: 16, 96>}, {pipeline_mode = #tpu.pipeline_mode<synchronous>, transform_indices = @transform_2, window_bounds = array<i64: 96, 96>}, {pipeline_mode = #tpu.pipeline_mode<synchronous>, transform_indices = @transform_3, window_bounds = array<i64: 1, 96>}, {pipeline_mode = #tpu.pipeline_mode<synchronous>, transform_indices = @transform_4, window_bounds = array<i64: 1, 96>}, {pipeline_mode = #tpu.pipeline_mode<synchronous>, transform_indices = @transform_5, window_bounds = array<i64: 1, 96>}, {pipeline_mode = #tpu.pipeline_mode<synchronous>, transform_indices = @transform_6, window_bounds = array<i64: 96, 384>}, {pipeline_mode = #tpu.pipeline_mode<synchronous>, transform_indices = @transform_7, window_bounds = array<i64: 1, 384>}, {pipeline_mode = #tpu.pipeline_mode<synchronous>, transform_indices = @transform_8, window_bounds = array<i64: 384, 96>}, {pipeline_mode = #tpu.pipeline_mode<synchronous>, transform_indices = @transform_9, window_bounds = array<i64: 1, 96>}, {transform_indices = @transform_10, window_bounds = array<i64: 16, 96>}]} {
    %c0 = arith.constant 0 : index
    %c0_0 = arith.constant 0 : index
    %0 = vector.load %arg1[%c0, %c0_0] : memref<16x96xbf16, #tpu.memory_space<vmem>>, vector<16x96xbf16>
    %c0_1 = arith.constant 0 : index
    %c0_2 = arith.constant 0 : index
    %1 = vector.load %arg3[%c0_1, %c0_2] : memref<96x96xbf16, #tpu.memory_space<vmem>>, vector<96x96xbf16>
    %cst = arith.constant dense<0.000000e+00> : vector<16x96xf32>
    %2 = tpu.matmul %0, %1, %cst {dimension_numbers = #tpu.dot_dimension_numbers<[1], [0], [0], [1], [0, 0, 1, 1], [], []>} : vector<16x96xbf16>, vector<96x96xbf16>, vector<16x96xf32> -> vector<16x96xf32>
    %c0_3 = arith.constant 0 : index
    %c0_4 = arith.constant 0 : index
    %3 = vector.load %arg4[%c0_3, %c0_4] : memref<1x96xf32, #tpu.memory_space<vmem>>, vector<1x96xf32>
    %4 = vector.broadcast %3 : vector<1x96xf32> to vector<16x96xf32>
    %5 = arith.addf %2, %4 : vector<16x96xf32>
    %c0_5 = arith.constant 0 : index
    %c0_6 = arith.constant 0 : index
    %6 = vector.load %arg2[%c0_5, %c0_6] : memref<16x96xf32, #tpu.memory_space<vmem>>, vector<16x96xf32>
    %7 = arith.addf %5, %6 : vector<16x96xf32>
    %c0_7 = arith.constant 0 : index
    %c0_8 = arith.constant 0 : index
    %8 = vector.load %arg5[%c0_7, %c0_8] : memref<1x96xf32, #tpu.memory_space<vmem>>, vector<1x96xf32>
    %c0_9 = arith.constant 0 : index
    %c0_10 = arith.constant 0 : index
    %9 = vector.load %arg6[%c0_9, %c0_10] : memref<1x96xf32, #tpu.memory_space<vmem>>, vector<1x96xf32>
    %cst_11 = arith.constant dense<0.000000e+00> : vector<16xf32>
    %10 = vector.multi_reduction <add>, %7, %cst_11 [1] : vector<16x96xf32> to vector<16xf32>
    %11 = vector.shape_cast %10 : vector<16xf32> to vector<16x1xf32>
    %cst_12 = arith.constant 9.600000e+01 : f32
    %12 = vector.broadcast %cst_12 : f32 to vector<16x1xf32>
    %13 = arith.divf %11, %12 : vector<16x1xf32>
    %14 = vector.broadcast %13 : vector<16x1xf32> to vector<16x96xf32>
    %15 = arith.subf %7, %14 : vector<16x96xf32>
    %16 = arith.mulf %15, %15 : vector<16x96xf32>
    %cst_13 = arith.constant dense<0.000000e+00> : vector<16xf32>
    %17 = vector.multi_reduction <add>, %16, %cst_13 [1] : vector<16x96xf32> to vector<16xf32>
    %18 = vector.shape_cast %17 : vector<16xf32> to vector<16x1xf32>
    %cst_14 = arith.constant 9.600000e+01 : f32
    %19 = vector.broadcast %cst_14 : f32 to vector<16x1xf32>
    %20 = arith.divf %18, %19 : vector<16x1xf32>
    %cst_15 = arith.constant 9.99999997E-7 : f32
    %21 = vector.broadcast %cst_15 : f32 to vector<16x1xf32>
    %22 = arith.addf %20, %21 : vector<16x1xf32>
    %23 = math.rsqrt %22 : vector<16x1xf32>
    %24 = vector.broadcast %23 : vector<16x1xf32> to vector<16x96xf32>
    %25 = arith.mulf %15, %24 : vector<16x96xf32>
    %26 = vector.broadcast %8 : vector<1x96xf32> to vector<16x96xf32>
    %27 = arith.mulf %25, %26 : vector<16x96xf32>
    %28 = vector.broadcast %9 : vector<1x96xf32> to vector<16x96xf32>
    %29 = arith.addf %27, %28 : vector<16x96xf32>
    %30 = arith.truncf %29 : vector<16x96xf32> to vector<16x96xbf16>
    %c0_16 = arith.constant 0 : index
    %c0_17 = arith.constant 0 : index
    %31 = vector.load %arg7[%c0_16, %c0_17] : memref<96x384xbf16, #tpu.memory_space<vmem>>, vector<96x384xbf16>
    %cst_18 = arith.constant dense<0.000000e+00> : vector<16x384xf32>
    %32 = tpu.matmul %30, %31, %cst_18 {dimension_numbers = #tpu.dot_dimension_numbers<[1], [0], [0], [1], [0, 0, 1, 1], [], []>} : vector<16x96xbf16>, vector<96x384xbf16>, vector<16x384xf32> -> vector<16x384xf32>
    %c0_19 = arith.constant 0 : index
    %c0_20 = arith.constant 0 : index
    %33 = vector.load %arg8[%c0_19, %c0_20] : memref<1x384xf32, #tpu.memory_space<vmem>>, vector<1x384xf32>
    %34 = vector.broadcast %33 : vector<1x384xf32> to vector<16x384xf32>
    %35 = arith.addf %32, %34 : vector<16x384xf32>
    %cst_21 = arith.constant 0.707106769 : f32
    %36 = vector.broadcast %cst_21 : f32 to vector<16x384xf32>
    %37 = arith.mulf %35, %36 : vector<16x384xf32>
    %cst_22 = arith.constant 0.000000e+00 : f32
    %38 = vector.broadcast %cst_22 : f32 to vector<16x384xf32>
    %39 = arith.cmpf oge, %37, %38 : vector<16x384xf32>
    %cst_23 = arith.constant 1.000000e+00 : f32
    %cst_24 = arith.constant -1.000000e+00 : f32
    %40 = vector.broadcast %cst_23 : f32 to vector<16x384xf32>
    %41 = vector.broadcast %cst_24 : f32 to vector<16x384xf32>
    %42 = arith.select %39, %40, %41 : vector<16x384xi1>, vector<16x384xf32>
    %43 = math.absf %37 : vector<16x384xf32>
    %cst_25 = arith.constant 0.327591091 : f32
    %44 = vector.broadcast %cst_25 : f32 to vector<16x384xf32>
    %45 = arith.mulf %44, %43 : vector<16x384xf32>
    %cst_26 = arith.constant 1.000000e+00 : f32
    %46 = vector.broadcast %cst_26 : f32 to vector<16x384xf32>
    %47 = arith.addf %46, %45 : vector<16x384xf32>
    %48 = tpu.reciprocal %47 {approx = true} : vector<16x384xf32> -> vector<16x384xf32>
    %cst_27 = arith.constant 1.06140542 : f32
    %49 = vector.broadcast %cst_27 : f32 to vector<16x384xf32>
    %50 = arith.mulf %49, %48 : vector<16x384xf32>
    %cst_28 = arith.constant -1.45315206 : f32
    %51 = vector.broadcast %cst_28 : f32 to vector<16x384xf32>
    %52 = arith.addf %50, %51 : vector<16x384xf32>
    %53 = arith.mulf %52, %48 : vector<16x384xf32>
    %cst_29 = arith.constant 1.42141378 : f32
    %54 = vector.broadcast %cst_29 : f32 to vector<16x384xf32>
    %55 = arith.addf %53, %54 : vector<16x384xf32>
    %56 = arith.mulf %55, %48 : vector<16x384xf32>
    %cst_30 = arith.constant -0.284496725 : f32
    %57 = vector.broadcast %cst_30 : f32 to vector<16x384xf32>
    %58 = arith.addf %56, %57 : vector<16x384xf32>
    %59 = arith.mulf %58, %48 : vector<16x384xf32>
    %cst_31 = arith.constant 0.254829586 : f32
    %60 = vector.broadcast %cst_31 : f32 to vector<16x384xf32>
    %61 = arith.addf %59, %60 : vector<16x384xf32>
    %62 = arith.mulf %61, %48 : vector<16x384xf32>
    %cst_32 = arith.constant 0.000000e+00 : f32
    %63 = vector.broadcast %cst_32 : f32 to vector<16x384xf32>
    %64 = arith.subf %63, %43 : vector<16x384xf32>
    %65 = arith.mulf %64, %43 : vector<16x384xf32>
    %66 = math.exp %65 : vector<16x384xf32>
    %67 = arith.mulf %62, %66 : vector<16x384xf32>
    %cst_33 = arith.constant 1.000000e+00 : f32
    %68 = vector.broadcast %cst_33 : f32 to vector<16x384xf32>
    %69 = arith.subf %68, %67 : vector<16x384xf32>
    %70 = arith.mulf %42, %69 : vector<16x384xf32>
    %cst_34 = arith.constant 5.000000e-01 : f32
    %71 = vector.broadcast %cst_34 : f32 to vector<16x384xf32>
    %72 = arith.mulf %71, %35 : vector<16x384xf32>
    %cst_35 = arith.constant 1.000000e+00 : f32
    %73 = vector.broadcast %cst_35 : f32 to vector<16x384xf32>
    %74 = arith.addf %73, %70 : vector<16x384xf32>
    %75 = arith.mulf %72, %74 : vector<16x384xf32>
    %76 = arith.truncf %75 : vector<16x384xf32> to vector<16x384xbf16>
    %c0_36 = arith.constant 0 : index
    %c0_37 = arith.constant 0 : index
    %77 = vector.load %arg9[%c0_36, %c0_37] : memref<384x96xbf16, #tpu.memory_space<vmem>>, vector<384x96xbf16>
    %cst_38 = arith.constant dense<0.000000e+00> : vector<16x96xf32>
    %78 = tpu.matmul %76, %77, %cst_38 {dimension_numbers = #tpu.dot_dimension_numbers<[1], [0], [0], [1], [0, 0, 1, 1], [], []>} : vector<16x384xbf16>, vector<384x96xbf16>, vector<16x96xf32> -> vector<16x96xf32>
    %c0_39 = arith.constant 0 : index
    %c0_40 = arith.constant 0 : index
    %79 = vector.load %arg10[%c0_39, %c0_40] : memref<1x96xf32, #tpu.memory_space<vmem>>, vector<1x96xf32>
    %80 = vector.broadcast %79 : vector<1x96xf32> to vector<16x96xf32>
    %81 = arith.addf %78, %80 : vector<16x96xf32>
    %82 = arith.addf %81, %7 : vector<16x96xf32>
    %c0_41 = arith.constant 0 : index
    %c0_42 = arith.constant 0 : index
    %83 = vector.load %arg11[%c0_41, %c0_42] : memref<16x96xf32, #tpu.memory_space<vmem>>, vector<16x96xf32>
    tpu.vector_store %arg11[%c0_41, %c0_42], %82 {strides = array<i32>} : memref<16x96xf32, #tpu.memory_space<vmem>>, vector<16x96xf32>,
    return
  }
  func.func @transform_0(%arg0: i32) -> (i32, i32) {
    %c0_i32 = arith.constant 0 : i32
    %c0_i32_0 = arith.constant 0 : i32
    return %arg0, %c0_i32 : i32, i32
  }
  func.func @transform_1(%arg0: i32) -> (i32, i32) {
    %c0_i32 = arith.constant 0 : i32
    %c0_i32_0 = arith.constant 0 : i32
    return %arg0, %c0_i32 : i32, i32
  }
  func.func @transform_2(%arg0: i32) -> (i32, i32) {
    %c0_i32 = arith.constant 0 : i32
    %c0_i32_0 = arith.constant 0 : i32
    %c0_i32_1 = arith.constant 0 : i32
    return %c0_i32, %c0_i32_0 : i32, i32
  }
  func.func @transform_3(%arg0: i32) -> (i32, i32) {
    %c0_i32 = arith.constant 0 : i32
    %c0_i32_0 = arith.constant 0 : i32
    %c0_i32_1 = arith.constant 0 : i32
    return %c0_i32, %c0_i32_0 : i32, i32
  }
  func.func @transform_4(%arg0: i32) -> (i32, i32) {
    %c0_i32 = arith.constant 0 : i32
    %c0_i32_0 = arith.constant 0 : i32
    %c0_i32_1 = arith.constant 0 : i32
    return %c0_i32, %c0_i32_0 : i32, i32
  }
  func.func @transform_5(%arg0: i32) -> (i32, i32) {
    %c0_i32 = arith.constant 0 : i32
    %c0_i32_0 = arith.constant 0 : i32
    %c0_i32_1 = arith.constant 0 : i32
    return %c0_i32, %c0_i32_0 : i32, i32
  }
  func.func @transform_6(%arg0: i32) -> (i32, i32) {
    %c0_i32 = arith.constant 0 : i32
    %c0_i32_0 = arith.constant 0 : i32
    %c0_i32_1 = arith.constant 0 : i32
    return %c0_i32, %c0_i32_0 : i32, i32
  }
  func.func @transform_7(%arg0: i32) -> (i32, i32) {
    %c0_i32 = arith.constant 0 : i32
    %c0_i32_0 = arith.constant 0 : i32
    %c0_i32_1 = arith.constant 0 : i32
    return %c0_i32, %c0_i32_0 : i32, i32
  }
  func.func @transform_8(%arg0: i32) -> (i32, i32) {
    %c0_i32 = arith.constant 0 : i32
    %c0_i32_0 = arith.constant 0 : i32
    %c0_i32_1 = arith.constant 0 : i32
    return %c0_i32, %c0_i32_0 : i32, i32
  }
  func.func @transform_9(%arg0: i32) -> (i32, i32) {
    %c0_i32 = arith.constant 0 : i32
    %c0_i32_0 = arith.constant 0 : i32
    %c0_i32_1 = arith.constant 0 : i32
    return %c0_i32, %c0_i32_0 : i32, i32
  }
  func.func @transform_10(%arg0: i32) -> (i32, i32) {
    %c0_i32 = arith.constant 0 : i32
    %c0_i32_0 = arith.constant 0 : i32
    return %arg0, %c0_i32 : i32, i32
  }
}

</mosaic_0001>

<bundles_post_ra>
// kernel: block_forward.3
= control target key start
LH: loop header
LB: loop body
LE: loop exit
PB: predicated region body
PF: predicated region fallthrough
CT: control target
= control target key end

     0   :  { %17 = vsyncpa [#allocation3], 0  ;;  %s814_s0 = inlined_call_operand.vmem [shape: f32[16,96], index: 0, kind: input, shape index: {}]   ;;  %s815_s1 = inlined_call_operand.vmem [shape: f32[1,96], index: 1, kind: input, shape index: {}]   ;;  %s816_s2 = inlined_call_operand.vmem [shape: f32[1,96], index: 2, kind: input, shape index: {}]   ;;  %s817_s3 = inlined_call_operand.hbm [shape: bf16[96,96], index: 3, kind: input, shape index: {}]   ;;  %s818_s4 = inlined_call_operand.vmem [shape: f32[1,96], index: 4, kind: input, shape index: {}]   ;;  %s819_s5 = inlined_call_operand.hbm [shape: bf16[96,96], index: 5, kind: input, shape index: {}]   ;;  %s820_s6 = inlined_call_operand.vmem [shape: f32[1,96], index: 6, kind: input, shape index: {}]   ;;  %s821_s7 = inlined_call_operand.hbm [shape: bf16[96,96], index: 7, kind: input, shape index: {}]   ;;  %s822_s8 = inlined_call_operand.vmem [shape: f32[1,96], index: 8, kind: input, shape index: {}]   ;;  %s823_s9 = inlined_call_operand.vmem [shape: bf16[16,96], index: 9, kind: output, shape index: {0}]   ;;  %s824_s10 = inlined_call_operand.vmem [shape: bf16[16,96], index: 10, kind: output, shape index: {1}]   ;;  %s825_s11 = inlined_call_operand.vmem [shape: bf16[16,96], index: 11, kind: output, shape index: {2}]  }
   0x1   :  { %18 = vsyncpa [#allocation5], 0  ;;  %s662_s17 = smov [#allocation4]   ;;  %s663_s19 = smov [#allocation2]  }
   0x2   :  { %s44_s18 = sshll.u32 %s662_s17, 4  ;;  %s30_s20 = sshll.u32 %s663_s19, 4  ;;  %s45_s18 = int_to_ptr.vmem [resolvable:$true] %s44_s18  ;;  %s31_s20 = int_to_ptr.vmem [resolvable:$true] %s30_s20 }
   0x3   :  { %s606_s21 = scalar_lea.vmem %s45_s18, 768  ;;  %p611_p1 = scmp.lt.s32.totalorder %s45_s18, %s45_s18 }
   0x4   :  { %p607_p0 = scmp.ne.s32.totalorder %s45_s18, %s606_s21  ;;  %p612_p2 = scmp.lt.s32.totalorder %s606_s21, %s606_s21 }
   0x6   :  { %p613_p3 = por %p612_p2, %p611_p1 }
   0x8   :  { %p614_p4 = pnand %p613_p3, %p607_p0 }
   0xa   :  { %617 = shalt.err (!%p614_p4)
}
   0xb   :  { %s664_s22 = smov 64   ;;  %s665_s23 = smov 4  }
   0xc   :  { %50 = dma.hbm_to_vmem [thread:$0]  %s819_s5, 768, %s45_s18, [#allocation5], %s664_s22, %s664_s22, %s665_s23  }
   0xd   :  { %s626_s26 = scalar_lea.vmem %s31_s20, 768  ;;  %p631_p6 = scmp.lt.s32.totalorder %s31_s20, %s31_s20 }
   0xe   :  { %p627_p5 = scmp.ne.s32.totalorder %s31_s20, %s626_s26  ;;  %p632_p7 = scmp.lt.s32.totalorder %s626_s26, %s626_s26 }
  0x10   :  { %p633_p8 = por %p632_p7, %p631_p6 }
  0x12   :  { %p634_p9 = pnand %p633_p8, %p627_p5 }
  0x14   :  { %637 = shalt.err (!%p634_p9)
}
  0x15   :  { %36 = dma.hbm_to_vmem [thread:$0]  %s817_s3, 768, %s31_s20, [#allocation3], %s664_s22, %s664_s22, %s665_s23  }
  0x16   :  { %s666_s29 = smov [#allocation6]  }
  0x17   :  { %s58_s30 = sshll.u32 %s666_s29, 4  ;;  %s59_s30 = int_to_ptr.vmem [resolvable:$true] %s58_s30 }
  0x18   :  { %s646_s12 = scalar_lea.vmem %s59_s30, 768  ;;  %p651_p11 = scmp.lt.s32.totalorder %s59_s30, %s59_s30 }
  0x19   :  { %p647_p10 = scmp.ne.s32.totalorder %s59_s30, %s646_s12  ;;  %p652_p12 = scmp.lt.s32.totalorder %s646_s12, %s646_s12 }
  0x1b   :  { %p653_p13 = por %p652_p12, %p651_p11 }
  0x1d   :  { %p654_p0 = pnand %p653_p13, %p647_p10 }
  0x1f   :  { %657 = shalt.err (!%p654_p0)
}
  0x20   :  { %64 = dma.hbm_to_vmem [thread:$0]  %s821_s7, 768, %s59_s30, [#allocation5], %s664_s22, %s664_s22, %s665_s23  }
  0x21   :  { %658 = dma.done.wait [#allocation3], 768  }
  0x22   :  { %659 = vsyncadd [#allocation3], 4294966528 }
  0x23   :  { %660 = dma.done.wait [#allocation5], 1536  }
  0x24   :  { %661 = vsyncadd [#allocation5], 4294965760  ;;  %vm81_vm0 = vcmask 785408   ;;  %v77_v0 = vld [vmem:[%s814_s0] sm:$0xff]  ;;  %v78_v1 = vld [vmem:[%s814_s0 + $0x8] sm:$0xff]  ;;  %v667_v15 = vmov 0.0  }
  0x25   :  { %v82_v2 = vsel %vm81_vm0, %v77_v0, 0.0  ;;  %v85_v3 = vsel %vm81_vm0, %v78_v1, 0.0  ;;  %v576_v14 = vld [vmem:[#allocation2 + $0x28] sm:$0xff]   ;;  %521 = vmatprep.subr.bf16.mxu0 %v667_v15  ;;  %537 = vmatprep.subr.bf16.mxu1 %v667_v15  ;;  %v577_v16 = vld [vmem:[#allocation4 + $0x28] sm:$0xff]   ;;  %v578_v17 = vld [vmem:[#allocation2 + $0x20] sm:$0xff]   ;;  %vm668_vm1 = vmmov 0  }
  0x26   :  { %83 = vadd.xlane.f32.xlu0 %v82_v2  ;;  %522 = vmatpush3.bf16.msra.mxu0 %v576_v14  ;;  %v579_v18 = vld [vmem:[#allocation4 + $0x20] sm:$0xff]   ;;  %v580_v19 = vld [vmem:[#allocation2 + $0x18] sm:$0xff]   ;;  %v581_v20 = vld [vmem:[#allocation4 + $0x18] sm:$0xff]   ;;  %vm233_vm2 = vcmask 781312  }
  0x27   :  { %538 = vmatpush3.bf16.msra.mxu1 %v577_v16  ;;  %523 = vmatprep.subr.bf16.mxu0 %v667_v15  ;;  %v582_v21 = vld [vmem:[#allocation2 + $0x10] sm:$0xff]   ;;  %v583_v22 = vld [vmem:[#allocation4 + $0x10] sm:$0xff]   ;;  %v584_v23 = vld [vmem:[#allocation2 + $0x8] sm:$0xff]  }
  0x28   :  { %539 = vmatprep.subr.bf16.mxu1 %v667_v15  ;;  %533 = vmatprep.mubr.msk.bf16.mxu0 %vm668_vm1, %v667_v15  ;;  %v585_v24 = vld [vmem:[#allocation4 + $0x8] sm:$0xff]   ;;  %v586_v25 = vld [vmem:[#allocation2] sm:$0xff]   ;;  %v587_v26 = vld [vmem:[#allocation4] sm:$0xff]  }
  0x29   :  { %549 = vmatprep.mubr.msk.bf16.mxu1 %vm668_vm1, %v667_v15  ;;  %v462_v35 = vld [vmem:[%s815_s1] ss:$0 sm:$0xff]  ;;  %v588_v43 = vld [vmem:[#allocation6 + $0x28] sm:$0xff]   ;;  %v590_v46 = vld [vmem:[#allocation6 + $0x18] sm:$0xff]  }
  0x2a   :  { %86 = vadd.xlane.f32.xlu0 %v85_v3  ;;  %524 = vmatpush3.bf16.msra.mxu0 %v578_v17  ;;  %v463_v39 = vld [vmem:[%s816_s2] ss:$0 sm:$0xff]  ;;  %v591_v47 = vld [vmem:[#allocation6 + $0x10] sm:$0xff]   ;;  %v592_v48 = vld [vmem:[#allocation6 + $0x8] sm:$0xff]  }
  0x2b   :  { %540 = vmatpush3.bf16.msra.mxu1 %v579_v18  ;;  %525 = vmatprep.subr.bf16.mxu0 %v667_v15  ;;  %v589_v45 = vld [vmem:[#allocation6 + $0x20] sm:$0xff]  }
  0x2c   :  { %541 = vmatprep.subr.bf16.mxu1 %v667_v15  ;;  %v593_v49 = vld [vmem:[#allocation6] sm:$0xff]  }
  0x2d   :  { %v464_v50 = vld [vmem:[%s818_s4] ss:$0 sm:$0xff] }
  0x2e   :  { %526 = vmatpush3.bf16.msra.mxu0 %v580_v19  ;;  %v474_v51 = vld [vmem:[%s820_s6] ss:$0 sm:$0xff] }
  0x2f   :  { %542 = vmatpush3.bf16.msra.mxu1 %v581_v20  ;;  %527 = vmatprep.subr.bf16.mxu0 %v667_v15 }
  0x30   :  { %543 = vmatprep.subr.bf16.mxu1 %v667_v15 }
  0x32   :  { %528 = vmatpush3.bf16.msra.mxu0 %v582_v21 }
  0x33   :  { %544 = vmatpush3.bf16.msra.mxu1 %v583_v22  ;;  %529 = vmatprep.subr.bf16.mxu0 %v667_v15 }
  0x34   :  { %545 = vmatprep.subr.bf16.mxu1 %v667_v15 }
  0x36   :  { %530 = vmatpush3.bf16.msra.mxu0 %v584_v23 }
  0x37   :  { %546 = vmatpush3.bf16.msra.mxu1 %v585_v24  ;;  %531 = vmatprep.subr.bf16.mxu0 %v667_v15 }
  0x38   :  { %547 = vmatprep.subr.bf16.mxu1 %v667_v15 }
  0x3a   :  { %532 = vmatpush3.bf16.msra.mxu0 %v586_v25 }
  0x3b   :  { %548 = vmatpush3.bf16.msra.mxu1 %v587_v26  ;;  %553 = vmatprep.subr.bf16.mxu0 %v667_v15 }
  0xaf   :  { %v84_v4 = vpop.xlane.xlu0 %83 }
  0xb0   :  { %v89_v5 = vmul.f32 0.010416667, %v84_v4  ;;  %v484_v4 = vld [vmem:[%s822_s8] ss:$0 sm:$0xff] }
  0xb2   :  { %v91_v6 = vsub.f32 %v77_v0, %v89_v5 }
  0xb3   :  { %v87_v7 = vpop.xlane.xlu0 %86 }
  0xb4   :  { %v90_v8 = vmul.f32 0.010416667, %v87_v7  ;;  %v93_v9 = vmul.f32 %v91_v6, %v91_v6 }
  0xb6   :  { %v92_v10 = vsub.f32 %v78_v1, %v90_v8  ;;  %v95_v11 = vsel %vm81_vm0, %v93_v9, 0.0 }
  0xb7   :  { %96 = vadd.xlane.f32.xlu1 %v95_v11 }
  0xb8   :  { %v94_v12 = vmul.f32 %v92_v10, %v92_v10 }
  0xba   :  { %v98_v13 = vsel %vm81_vm0, %v94_v12, 0.0 }
  0xbb   :  { %99 = vadd.xlane.f32.xlu1 %v98_v13 }
 0x140   :  { %v97_v27 = vpop.xlane.xlu1 %96 }
 0x141   :  { %v101_v28 = vmul.f32 0.010416667, %v97_v27 }
 0x143   :  { %v103_v29 = vadd.f32 1e-06, %v101_v28 }
 0x144   :  { %v100_v30 = vpop.xlane.xlu1 %99 }
 0x145   :  { %594 = vrsqrt.f32 %v103_v29  ;;  %v102_v31 = vmul.f32 0.010416667, %v100_v30 }
 0x147   :  { %v104_v32 = vadd.f32 1e-06, %v102_v31 }
 0x149   :  { %596 = vrsqrt.f32 %v104_v32 }
 0x152   :  { %v595_v33 = vpop.eup %594 }
 0x153   :  { %v107_v34 = vmul.f32 %v595_v33, %v91_v6 }
 0x155   :  { %v115_v38 = vmul.f32 %v462_v35, %v107_v34 }
 0x156   :  { %v597_v36 = vpop.eup %596 }
 0x157   :  { %v108_v37 = vmul.f32 %v597_v36, %v92_v10  ;;  %v123_v41 = vadd.f32 %v463_v39, %v115_v38 }
 0x159   :  { %v116_v40 = vmul.f32 %v462_v35, %v108_v37 }
 0x15b   :  { %v124_v42 = vadd.f32 %v463_v39, %v116_v40 }
 0x15d   :  { %v125_v44 = vpack.c.bf16 %v124_v42, %v123_v41 }
 0x15f   :  { %534 = vmatmul.mubr.msk.bf16.vlgmr.msra.gmra.mxu0 %vm81_vm0, %v125_v44  ;;  %550 = vmatmul.mubr.msk.bf16.vlgmr.msra.gmra.mxu1 %vm81_vm0, %v125_v44 }
 0x160   :  { %554 = vmatpush3.bf16.msra.mxu0 %v588_v43  ;;  %565 = vmatprep.mubr.msk.bf16.mxu0 %vm668_vm1, %v667_v15 }
 0x161   :  { %555 = vmatprep.subr.bf16.mxu0 %v667_v15 }
 0x164   :  { %556 = vmatpush3.bf16.msra.mxu0 %v589_v45 }
 0x165   :  { %557 = vmatprep.subr.bf16.mxu0 %v667_v15 }
 0x168   :  { %558 = vmatpush3.bf16.msra.mxu0 %v590_v46 }
 0x169   :  { %559 = vmatprep.subr.bf16.mxu0 %v667_v15 }
 0x16c   :  { %560 = vmatpush3.bf16.msra.mxu0 %v591_v47 }
 0x16d   :  { %561 = vmatprep.subr.bf16.mxu0 %v667_v15 }
 0x170   :  { %562 = vmatpush3.bf16.msra.mxu0 %v592_v48 }
 0x171   :  { %563 = vmatprep.subr.bf16.mxu0 %v667_v15 }
 0x174   :  { %564 = vmatpush3.bf16.msra.mxu0 %v593_v49 }
 0x177   :  { %566 = vmatmul.mubr.msk.bf16.vlgmr.msra.gmra.mxu0 %vm81_vm0, %v125_v44 }
 0x21f   :  { %v218_v52 = vpop.f32.mrf.mxu0  ;;  %v325_v53 = vpop.f32.mrf.mxu1 }
 0x220   :  { %v219_v54 = vadd.f32 %v464_v50, %v218_v52  ;;  %v326_v55 = vadd.f32 %v474_v51, %v325_v53 }
 0x221   :  { %v535_v56 = vpop.f32.mrf.mxu0  ;;  %v551_v57 = vpop.f32.mrf.mxu1 }
 0x222   :  { %v494_v58 = vpack.c.bf16 %v219_v54, %v219_v54  ;;  %v496_v59 = vpack.c.bf16 %v326_v55, %v326_v55 }
 0x223   :  { %v221_v60 = vpop.f32.mrf.mxu0  ;;  %v328_v61 = vpop.f32.mrf.mxu1 }
 0x224   :  { %234 = vst.msk [vmem:[%s823_s9] sm:$0xf] %vm233_vm2, %v494_v58  ;;  %340 = vst.msk [vmem:[%s824_s10] sm:$0xf] %vm233_vm2, %v496_v59  ;;  %v222_v62 = vadd.f32 %v464_v50, %v221_v60  ;;  %v329_v63 = vadd.f32 %v474_v51, %v328_v61 }
 0x225   :  { %v536_v0 = vpop.f32.mrf.mxu0  ;;  %v552_v1 = vpop.f32.mrf.mxu1 }
 0x226   :  { %v495_v2 = vpack.c.bf16 %v222_v62, %v222_v62  ;;  %v497_v3 = vpack.c.bf16 %v329_v63, %v329_v63 }
 0x228   :  { %235 = vst.msk [vmem:[%s823_s9 + $0x4] sm:$0xf] %vm233_vm2, %v495_v2  ;;  %341 = vst.msk [vmem:[%s824_s10 + $0x4] sm:$0xf] %vm233_vm2, %v497_v3 }
 0x237   :  { %v431_v5 = vpop.f32.mrf.mxu0 }
 0x238   :  { %v432_v6 = vadd.f32 %v484_v4, %v431_v5 }
 0x239   :  { %v567_v7 = vpop.f32.mrf.mxu0 }
 0x23a   :  { %v498_v8 = vpack.c.bf16 %v432_v6, %v432_v6 }
 0x23b   :  { %v434_v9 = vpop.f32.mrf.mxu0 }
 0x23c   :  { %446 = vst.msk [vmem:[%s825_s11] sm:$0xf] %vm233_vm2, %v498_v8  ;;  %v435_v10 = vadd.f32 %v484_v4, %v434_v9 }
 0x23d   :  { %v568_v11 = vpop.f32.mrf.mxu0 }
 0x23e   :  { %v499_v12 = vpack.c.bf16 %v435_v10, %v435_v10 }
 0x240   :  { %447 = vst.msk [vmem:[%s825_s11 + $0x4] sm:$0xf] %vm233_vm2, %v499_v12 }
 0x241   :  { %460 = vsyncpa [#allocation3], 1 }
 0x242   :  { %461 = vsyncpa [#allocation5], 1 }

// kernel: block_forward.4
= control target key start
LH: loop header
LB: loop body
LE: loop exit
PB: predicated region body
PF: predicated region fallthrough
CT: control target
= control target key end

     0   :  { %10 = vsyncpa [#allocation3], 0  ;;  %s2578_s0 = inlined_call_operand.vmem [shape: bf16[2,12,8,8], index: 0, kind: input, shape index: {}]   ;;  %s2579_s1 = inlined_call_operand.vmem [shape: bf16[2,12,8,8], index: 1, kind: input, shape index: {}]   ;;  %s2580_s2 = inlined_call_operand.vmem [shape: bf16[2,12,8,8], index: 2, kind: input, shape index: {}]   ;;  %s2581_s3 = inlined_call_operand.vmem [shape: bf16[2,12,8,8], index: 3, kind: output, shape index: {0}]   ;;  %s2582_s4 = inlined_call_operand.hbm [shape: f32[2,8,8], index: 4, kind: output, shape index: {1}]  }
   0x1   :  { %12 = vsyncpa [#allocation3 + $0x1], 0  ;;  %s2137_s15 = smov 0   ;;  %s2139_s16 = smov 0  }
   0x2   :  { %s2141_s17 = smov 0   ;;  %s2143_s18 = smov 0  }
   0x3 LB: > { %s2158_s19 = sadd.s32 4294967295, %s2107_s18   ;;  %s1728_s20 = sadd.s32 4294967294, %s2107_s18   ;;  %s2107_s18 = sphi %s2143_s18, %s2588_s18   ;;  %s2103_s17 = sphi %s2141_s17, %s2587_s17   ;;  %s2099_s16 = sphi %s2139_s16, %s2586_s16   ;;  %s2095_s15 = sphi %s2137_s15, %s2585_s15  }
   0x4   : > { %s2162_s21 = sadd.s32 1, %s2107_s18   ;;  %s129_s22 = sadd.s32 1, %s2103_s17 }
   0x5   : > { %s126_s23 = ssub.s32 %s2107_s18, %s2162_s21  ;;  %p139_p0 = scmp.ne.s32.totalorder %s2103_s17, %s2099_s16 }
   0x6   : > { %p127_p1 = scmp.eq.s32.totalorder %s126_s23, 0  ;;  %p140_p2 = scmp.eq.s32.totalorder %s2158_s19, 1 }
   0x7   : > { %p145_p3 = scmp.ne.s32.totalorder %s2099_s16, %s2095_s15  ;;  %p146_p4 = scmp.eq.s32.totalorder %s1728_s20, 1 }
   0x8   : > { %s2173_s24 = scalar_select %p127_p1, %s2103_s17, %s129_s22  }
   0x9   : > { %p2175_p5 = por %p140_p2, %p139_p0  ;;  %p2179_p6 = por %p146_p4, %p145_p3 }
   0xa   : > { %p1731_p7 = scmp.ge.s32.totalorder %s2107_s18, 1  ;;  %p188_p8 = scmp.lt.s32.totalorder %s2107_s18, 3 }
   0xc   : > { %p189_p9 = pnand %p1731_p7, %p188_p8 }
   0xd   : > { %p229_p10 = scmp.lt.s32.totalorder (!%p189_p9), %s2158_s19, 1  ;;  %s226_s12 = sand.u32 (!%p189_p9), 1, %s2099_s16  }
   0xe   : > { %192 = sbr.rel (%p189_p9) target bundleno = 785 (0x311), region = 32  ;;  %s1732_s13 = sshll.u32 (!%p189_p9), %s226_s12, 3 }
   0xf   : > { %s228_s14 = scalar_lea.vmem (!%p189_p9), [#allocation2], %s1732_s13  ;;  %s1762_s20 = sshll.u32 (!%p189_p9), %s2158_s19, 7 }
  0x10   : > { %s1620_s22 = sshll.u32 (!%p189_p9), %s228_s14, 4  ;;  %s1618_s29 = scalar_lea.hbm (!%p189_p9), %s2582_s4, %s1762_s20  ;;  %s1621_s22 = int_to_ptr.vmem [resolvable:$true] %s1620_s22 }
  0x11   : > { %s1604_s30 = scalar_lea.sflag (!%p189_p9), [#allocation3], %s226_s12  ;;  %s2111_s6 = smov (!%p189_p9), [#allocation2]  }
  0x12   : > { %s2051_s7 = sshll.u32 (!%p189_p9), %s2111_s6, 4  ;;  %s2052_s7 = int_to_ptr.vmem [resolvable:$false] %s2051_s7 }
  0x13   : > { %v2109_v0 = vmov 0.0   ;;  %s230_s27 = scalar_select %p229_p10, %s2158_s19, 1  ;;  %vm2110_vm0 = vmmov 0   ;;  %vm286_vm1 = vcmask 64512   ;;  %vm1023_vm2 = vcmask 1043456  }
  0x14   : > { %1813 = vmatprep.subr.bf16.mxu0 %v2109_v0  ;;  %1819 = vmatprep.subr.bf16.mxu1 %v2109_v0  ;;  %p2054_p0 = scmp.lt.s32.totalorder %s1621_s22, %s2052_s7 }
  0x15   : > { %1815 = vmatprep.mubr.msk.bf16.mxu0 %vm2110_vm0, %v2109_v0  ;;  %1821 = vmatprep.mubr.msk.bf16.mxu1 %vm2110_vm0, %v2109_v0  ;;  %s2193_s28 = smul.u32 48, %s230_s27 }
  0x17   : > { %s2199_s5 = scalar_lea.vmem %s2579_s1, %s2193_s28  ;;  %s2209_s8 = scalar_lea.vmem %s2578_s0, %s2193_s28 }
  0x18   : > { %v262_v1 = vld [vmem:[%s2199_s5] sm:$0xf]  ;;  %v263_v2 = vld [vmem:[%s2199_s5 + $0x4] sm:$0xf]  ;;  %v264_v5 = vld [vmem:[%s2199_s5 + $0x8] sm:$0xf]  ;;  %s2381_s11 = scalar_lea.vmem %s2580_s2, %s2193_s28 }
  0x19   : > { %v291_v3 = vsel %vm286_vm1, %v262_v1, 0  ;;  %v337_v4 = vsel %vm286_vm1, %v263_v2, 0  ;;  %v265_v6 = vld [vmem:[%s2199_s5 + $0xc] sm:$0xf]  ;;  %v250_v7 = vld [vmem:[%s2209_s8] sm:$0xf] }
  0x1a   : > { %1814 = vmatpush3.bf16.xpose.msra.mxu0 %v291_v3  ;;  %1820 = vmatpush3.bf16.xpose.msra.mxu1 %v337_v4  ;;  %v251_v8 = vld [vmem:[%s2209_s8 + $0x4] sm:$0xf]  ;;  %v383_v9 = vsel %vm286_vm1, %v264_v5, 0  ;;  %v429_v10 = vsel %vm286_vm1, %v265_v6, 0  ;;  %v266_v11 = vld [vmem:[%s2199_s5 + $0x10] sm:$0xf] }
  0x1b   : > { %1825 = vmatprep.subr.bf16.mxu0 %v2109_v0  ;;  %1831 = vmatprep.subr.bf16.mxu1 %v2109_v0  ;;  %v267_v12 = vld [vmem:[%s2199_s5 + $0x14] sm:$0xf]  ;;  %v252_v13 = vld [vmem:[%s2209_s8 + $0x8] sm:$0xf]  ;;  %v253_v14 = vld [vmem:[%s2209_s8 + $0xc] sm:$0xf] }
  0x1c   : > { %v475_v15 = vsel %vm286_vm1, %v266_v11, 0  ;;  %v521_v16 = vsel %vm286_vm1, %v267_v12, 0  ;;  %v268_v17 = vld [vmem:[%s2199_s5 + $0x18] sm:$0xf]  ;;  %v269_v18 = vld [vmem:[%s2199_s5 + $0x1c] sm:$0xf] }
  0x1d   : > { %v254_v19 = vld [vmem:[%s2209_s8 + $0x10] sm:$0xf]  ;;  %v255_v20 = vld [vmem:[%s2209_s8 + $0x14] sm:$0xf]  ;;  %v567_v21 = vsel %vm286_vm1, %v268_v17, 0  ;;  %v613_v22 = vsel %vm286_vm1, %v269_v18, 0 }
  0x1e   : > { %v270_v23 = vld [vmem:[%s2199_s5 + $0x20] sm:$0xf]  ;;  %v271_v24 = vld [vmem:[%s2199_s5 + $0x24] sm:$0xf]  ;;  %v256_v25 = vld [vmem:[%s2209_s8 + $0x18] sm:$0xf] }
  0x1f   : > { %v257_v26 = vld [vmem:[%s2209_s8 + $0x1c] sm:$0xf]  ;;  %v659_v27 = vsel %vm286_vm1, %v270_v23, 0  ;;  %v705_v28 = vsel %vm286_vm1, %v271_v24, 0  ;;  %v272_v29 = vld [vmem:[%s2199_s5 + $0x28] sm:$0xf] }
  0x20   : > { %v273_v30 = vld [vmem:[%s2199_s5 + $0x2c] sm:$0xf]  ;;  %v258_v31 = vld [vmem:[%s2209_s8 + $0x20] sm:$0xf]  ;;  %v259_v32 = vld [vmem:[%s2209_s8 + $0x24] sm:$0xf] }
  0x21   : > { %1816 = vmatmul.mubr.msk.bf16.vlgmr.msra.gmra.mxu0 %vm286_vm1, %v250_v7  ;;  %1822 = vmatmul.mubr.msk.bf16.vlgmr.msra.gmra.mxu1 %vm286_vm1, %v251_v8  ;;  %v751_v33 = vsel %vm286_vm1, %v272_v29, 0  ;;  %v797_v34 = vsel %vm286_vm1, %v273_v30, 0  ;;  %v260_v35 = vld [vmem:[%s2209_s8 + $0x28] sm:$0xf]  ;;  %v261_v36 = vld [vmem:[%s2209_s8 + $0x2c] sm:$0xf] }
  0x22   : > { %1826 = vmatpush3.bf16.xpose.msra.mxu0 %v383_v9  ;;  %1832 = vmatpush3.bf16.xpose.msra.mxu1 %v429_v10  ;;  %s2047_s5 = scalar_lea.vmem %s1621_s22, 128  ;;  %s2053_s8 = scalar_lea.vmem %s2052_s7, 256 }
  0x23   : > { %1827 = vmatprep.mubr.msk.bf16.mxu0 %vm2110_vm0, %v2109_v0  ;;  %1833 = vmatprep.mubr.msk.bf16.mxu1 %vm2110_vm0, %v2109_v0  ;;  %p2048_p11 = scmp.ne.s32.totalorder %s1621_s22, %s2047_s5  ;;  %p2055_p1 = scmp.lt.s32.totalorder %s2053_s8, %s2047_s5 }
  0x24   : > { %1837 = vmatprep.subr.bf16.mxu0 %v2109_v0  ;;  %1843 = vmatprep.subr.bf16.mxu1 %v2109_v0 }
  0x25   : > { %p2049_p12 = pnand %p2048_p11, %p2175_p5  ;;  %p2056_p2 = por %p2055_p1, %p2054_p0 }
  0x27   : > { %p2050_p13 = pneg %p2049_p12 }
  0x29   : > { %1828 = vmatmul.mubr.msk.bf16.vlgmr.msra.gmra.mxu0 %vm286_vm1, %v252_v13  ;;  %1834 = vmatmul.mubr.msk.bf16.vlgmr.msra.gmra.mxu1 %vm286_vm1, %v253_v14  ;;  %p2057_p3 = pnand %p2056_p2, %p2050_p13 }
  0x2a   : > { %1838 = vmatpush3.bf16.xpose.msra.mxu0 %v475_v15  ;;  %1844 = vmatpush3.bf16.xpose.msra.mxu1 %v521_v16 }
  0x2b   : > { %1839 = vmatprep.mubr.msk.bf16.mxu0 %vm2110_vm0, %v2109_v0  ;;  %1845 = vmatprep.mubr.msk.bf16.mxu1 %vm2110_vm0, %v2109_v0 }
  0x2c   : > { %1849 = vmatprep.subr.bf16.mxu0 %v2109_v0  ;;  %1855 = vmatprep.subr.bf16.mxu1 %v2109_v0 }
  0x31   : > { %1840 = vmatmul.mubr.msk.bf16.vlgmr.msra.gmra.mxu0 %vm286_vm1, %v254_v19  ;;  %1846 = vmatmul.mubr.msk.bf16.vlgmr.msra.gmra.mxu1 %vm286_vm1, %v255_v20 }
  0x32   : > { %1850 = vmatpush3.bf16.xpose.msra.mxu0 %v567_v21  ;;  %1856 = vmatpush3.bf16.xpose.msra.mxu1 %v613_v22 }
  0x33   : > { %1851 = vmatprep.mubr.msk.bf16.mxu0 %vm2110_vm0, %v2109_v0  ;;  %1857 = vmatprep.mubr.msk.bf16.mxu1 %vm2110_vm0, %v2109_v0 }
  0x34   : > { %1861 = vmatprep.subr.bf16.mxu0 %v2109_v0  ;;  %1867 = vmatprep.subr.bf16.mxu1 %v2109_v0 }
  0x39   : > { %1852 = vmatmul.mubr.msk.bf16.vlgmr.msra.gmra.mxu0 %vm286_vm1, %v256_v25  ;;  %1858 = vmatmul.mubr.msk.bf16.vlgmr.msra.gmra.mxu1 %vm286_vm1, %v257_v26 }
  0x3a   : > { %1862 = vmatpush3.bf16.xpose.msra.mxu0 %v659_v27  ;;  %1868 = vmatpush3.bf16.xpose.msra.mxu1 %v705_v28 }
  0x3b   : > { %1863 = vmatprep.mubr.msk.bf16.mxu0 %vm2110_vm0, %v2109_v0  ;;  %1869 = vmatprep.mubr.msk.bf16.mxu1 %vm2110_vm0, %v2109_v0 }
  0x3c   : > { %1873 = vmatprep.subr.bf16.mxu0 %v2109_v0  ;;  %1879 = vmatprep.subr.bf16.mxu1 %v2109_v0 }
  0x41   : > { %1864 = vmatmul.mubr.msk.bf16.vlgmr.msra.gmra.mxu0 %vm286_vm1, %v258_v31  ;;  %1870 = vmatmul.mubr.msk.bf16.vlgmr.msra.gmra.mxu1 %vm286_vm1, %v259_v32 }
  0x42   : > { %1874 = vmatpush3.bf16.xpose.msra.mxu0 %v751_v33  ;;  %1880 = vmatpush3.bf16.xpose.msra.mxu1 %v797_v34 }
  0x43   : > { %1875 = vmatprep.mubr.msk.bf16.mxu0 %vm2110_vm0, %v2109_v0  ;;  %1881 = vmatprep.mubr.msk.bf16.mxu1 %vm2110_vm0, %v2109_v0 }
  0x44   : > { %1885 = vmatprep.subr.bf16.mxu0 %v2109_v0  ;;  %1891 = vmatprep.subr.bf16.mxu1 %v2109_v0 }
  0x49   : > { %1876 = vmatmul.mubr.msk.bf16.vlgmr.msra.gmra.mxu0 %vm286_vm1, %v260_v35  ;;  %1882 = vmatmul.mubr.msk.bf16.vlgmr.msra.gmra.mxu1 %vm286_vm1, %v261_v36 }
  0x4a   : > { %1887 = vmatprep.mubr.msk.bf16.mxu0 %vm2110_vm0, %v2109_v0  ;;  %1893 = vmatprep.mubr.msk.bf16.mxu1 %vm2110_vm0, %v2109_v0 }
  0xe1   : > { %v327_v37 = vpop.f32.mrf.mxu0  ;;  %v373_v38 = vpop.f32.mrf.mxu1 }
  0xe2   : > { %v2291_v39 = vmul.f32 0.35355338, %v327_v37  ;;  %v2293_v40 = vmul.f32 0.35355338, %v373_v38 }
  0xe3   : > { %v1817_v41 = vpop.f32.mrf.mxu0  ;;  %v1823_v42 = vpop.f32.mrf.mxu1 }
  0xe4   : > { %v851_v43 = vsel %vm286_vm1, %v2291_v39, -inf  ;;  %v854_v46 = vsel %vm286_vm1, %v2293_v40, -inf }
  0xe5   : > { %v376_v44 = vpop.f32.mrf.mxu1  ;;  %852 = vmax.xlane.f32.xlu0 %v851_v43  ;;  %v330_v45 = vpop.f32.mrf.mxu0 }
  0xe7   : > { %v1818_v47 = vpop.f32.mrf.mxu0  ;;  %v1824_v48 = vpop.f32.mrf.mxu1 }
  0xe9   : > { %v465_v49 = vpop.f32.mrf.mxu1  ;;  %855 = vmax.xlane.f32.xlu0 %v854_v46  ;;  %v419_v50 = vpop.f32.mrf.mxu0 }
  0xea   : > { %v2299_v51 = vmul.f32 0.35355338, %v465_v49  ;;  %v2301_v52 = vmul.f32 0.35355338, %v419_v50 }
  0xeb   : > { %v1829_v53 = vpop.f32.mrf.mxu0  ;;  %v1835_v54 = vpop.f32.mrf.mxu1 }
  0xec   : > { %v857_v55 = vsel %vm286_vm1, %v2301_v52, -inf  ;;  %v860_v58 = vsel %vm286_vm1, %v2299_v51, -inf }
  0xed   : > { %v468_v56 = vpop.f32.mrf.mxu1  ;;  %858 = vmax.xlane.f32.xlu1 %v857_v55  ;;  %v422_v57 = vpop.f32.mrf.mxu0 }
  0xef   : > { %v1830_v59 = vpop.f32.mrf.mxu0  ;;  %v1836_v60 = vpop.f32.mrf.mxu1 }
  0xf1   : > { %v557_v61 = vpop.f32.mrf.mxu1  ;;  %861 = vmax.xlane.f32.xlu1 %v860_v58  ;;  %v511_v62 = vpop.f32.mrf.mxu0 }
  0xf2   : > { %v2307_v63 = vmul.f32 0.35355338, %v557_v61  ;;  %v2309_v1 = vmul.f32 0.35355338, %v511_v62 }
  0xf3   : > { %v1841_v2 = vpop.f32.mrf.mxu0  ;;  %v1847_v3 = vpop.f32.mrf.mxu1 }
  0xf4   : > { %v866_v4 = vsel %vm286_vm1, %v2307_v63, -inf  ;;  %v863_v5 = vsel %vm286_vm1, %v2309_v1, -inf }
  0xf5   : > { %v560_v6 = vpop.f32.mrf.mxu1  ;;  %867 = vmax.xlane.f32.xlu1 %v866_v4  ;;  %864 = vmax.xlane.f32.xlu0 %v863_v5  ;;  %v514_v7 = vpop.f32.mrf.mxu0 }
  0xf7   : > { %v1842_v8 = vpop.f32.mrf.mxu0  ;;  %v1848_v9 = vpop.f32.mrf.mxu1 }
  0xf9   : > { %v603_v10 = vpop.f32.mrf.mxu0  ;;  %v649_v11 = vpop.f32.mrf.mxu1 }
  0xfa   : > { %v2315_v12 = vmul.f32 0.35355338, %v603_v10  ;;  %v2317_v13 = vmul.f32 0.35355338, %v649_v11 }
  0xfb   : > { %v1853_v14 = vpop.f32.mrf.mxu0  ;;  %v1859_v15 = vpop.f32.mrf.mxu1 }
  0xfc   : > { %v872_v16 = vsel %vm286_vm1, %v2317_v13, -inf  ;;  %v869_v17 = vsel %vm286_vm1, %v2315_v12, -inf }
  0xfd   : > { %v652_v18 = vpop.f32.mrf.mxu1  ;;  %873 = vmax.xlane.f32.xlu1 %v872_v16  ;;  %870 = vmax.xlane.f32.xlu0 %v869_v17  ;;  %v606_v19 = vpop.f32.mrf.mxu0 }
  0xff   : > { %v1854_v20 = vpop.f32.mrf.mxu0  ;;  %v1860_v21 = vpop.f32.mrf.mxu1 }
 0x101   : > { %v695_v22 = vpop.f32.mrf.mxu0  ;;  %v741_v23 = vpop.f32.mrf.mxu1 }
 0x102   : > { %v2323_v24 = vmul.f32 0.35355338, %v695_v22  ;;  %v2325_v25 = vmul.f32 0.35355338, %v741_v23 }
 0x103   : > { %v1865_v26 = vpop.f32.mrf.mxu0  ;;  %v1871_v27 = vpop.f32.mrf.mxu1 }
 0x104   : > { %v878_v28 = vsel %vm286_vm1, %v2325_v25, -inf  ;;  %v875_v29 = vsel %vm286_vm1, %v2323_v24, -inf }
 0x105   : > { %v744_v30 = vpop.f32.mrf.mxu1  ;;  %879 = vmax.xlane.f32.xlu1 %v878_v28  ;;  %876 = vmax.xlane.f32.xlu0 %v875_v29  ;;  %v698_v31 = vpop.f32.mrf.mxu0 }
 0x107   : > { %v1866_v32 = vpop.f32.mrf.mxu0  ;;  %v1872_v33 = vpop.f32.mrf.mxu1 }
 0x109   : > { %v787_v34 = vpop.f32.mrf.mxu0  ;;  %v833_v35 = vpop.f32.mrf.mxu1 }
 0x10a   : > { %v2331_v36 = vmul.f32 0.35355338, %v787_v34  ;;  %v2333_v37 = vmul.f32 0.35355338, %v833_v35  ;;  %v274_v35 = vld [vmem:[%s2381_s11] sm:$0xf] }
 0x10b   : > { %v1877_v38 = vpop.f32.mrf.mxu0  ;;  %v1883_v41 = vpop.f32.mrf.mxu1 }
 0x10c   : > { %v884_v42 = vsel %vm286_vm1, %v2333_v37, -inf  ;;  %v881_v43 = vsel %vm286_vm1, %v2331_v36, -inf }
 0x10d   : > { %v836_v44 = vpop.f32.mrf.mxu1  ;;  %885 = vmax.xlane.f32.xlu1 %v884_v42  ;;  %882 = vmax.xlane.f32.xlu0 %v881_v43  ;;  %v790_v45 = vpop.f32.mrf.mxu0 }
 0x10e   : > { %v277_v45 = vld [vmem:[%s2381_s11 + $0xc] sm:$0xf] }
 0x10f   : > { %v1878_v46 = vpop.f32.mrf.mxu0  ;;  %v1884_v47 = vpop.f32.mrf.mxu1 }
 0x110   : > { %v276_v46 = vld [vmem:[%s2381_s11 + $0x8] sm:$0xf]  ;;  %v1163_v47 = vsel %vm1023_vm2, %v277_v45, 0 }
 0x16e   : > { %v853_v48 = vpop.xlane.xlu0 %852 }
 0x16f   : > { %v887_v49 = vsub.f32 %v2291_v39, %v853_v48  ;;  %v1117_v48 = vsel %vm1023_vm2, %v276_v46, 0 }
 0x171   : > { %v899_v50 = vmul.f32 1.442695, %v887_v49 }
 0x172   : > { %v856_v53 = vpop.xlane.xlu0 %855 }
 0x173   : > { %1999 = vpow2.f32 %v899_v50  ;;  %v888_v54 = vsub.f32 %v2293_v40, %v856_v53 }
 0x175   : > { %v901_v55 = vmul.f32 1.442695, %v888_v54 }
 0x176   : > { %v859_v56 = vpop.xlane.xlu1 %858 }
 0x177   : > { %2001 = vpow2.f32 %v901_v55  ;;  %v889_v57 = vsub.f32 %v2301_v52, %v859_v56  ;;  %v279_v55 = vld [vmem:[%s2381_s11 + $0x14] sm:$0xf]  ;;  %v278_v56 = vld [vmem:[%s2381_s11 + $0x10] sm:$0xf] }
 0x179   : > { %v903_v58 = vmul.f32 1.442695, %v889_v57  ;;  %v1255_v57 = vsel %vm1023_vm2, %v279_v55, 0 }
 0x17a   : > { %v862_v59 = vpop.xlane.xlu1 %861 }
 0x17b   : > { %2003 = vpow2.f32 %v903_v58  ;;  %v890_v60 = vsub.f32 %v2299_v51, %v862_v59  ;;  %v1209_v58 = vsel %vm1023_vm2, %v278_v56, 0  ;;  %v281_v59 = vld [vmem:[%s2381_s11 + $0x1c] sm:$0xf] }
 0x17d   : > { %v905_v61 = vmul.f32 1.442695, %v890_v60  ;;  %v280_v60 = vld [vmem:[%s2381_s11 + $0x18] sm:$0xf] }
 0x17e   : > { %v868_v62 = vpop.xlane.xlu1 %867  ;;  %v865_v2 = vpop.xlane.xlu0 %864 }
 0x17f   : > { %2005 = vpow2.f32 %v905_v61  ;;  %v892_v39 = vsub.f32 %v2307_v63, %v868_v62  ;;  %v891_v3 = vsub.f32 %v2309_v1, %v865_v2  ;;  %v2422_v61 = vsel %vm1023_vm2, %v281_v59, 0  ;;  %v282_v2 = vld [vmem:[%s2381_s11 + $0x20] sm:$0xf] }
 0x180   : > { %v2345_v4 = vpop.eup %1999  ;;  %v2425_v62 = vsel %vm1023_vm2, %v280_v60, 0 }
 0x181   : > { %v909_v40 = vmul.f32 1.442695, %v892_v39  ;;  %v907_v5 = vmul.f32 1.442695, %v891_v3  ;;  %v923_v52 = vsel %vm286_vm1, %v2345_v4, 0.0  ;;  %v2429_v39 = vsel %vm1023_vm2, %v282_v2, 0 }
 0x182   : > { %924 = vadd.xlane.f32.xlu0 %v923_v52  ;;  %v283_v3 = vld [vmem:[%s2381_s11 + $0x24] sm:$0xf] }
 0x183   : > { %2007 = vpow2.f32 %v909_v40  ;;  %v2433_v40 = vsel %vm1023_vm2, %v283_v3, 0 }
 0x184   : > { %v2349_v6 = vpop.eup %2001  ;;  %2009 = vpow2.f32 %v907_v5  ;;  %v284_v5 = vld [vmem:[%s2381_s11 + $0x28] sm:$0xf] }
 0x185   : > { %v926_v51 = vsel %vm286_vm1, %v2349_v6, 0.0  ;;  %v2437_v52 = vsel %vm1023_vm2, %v284_v5, 0 }
 0x186   : > { %927 = vadd.xlane.f32.xlu1 %v926_v51  ;;  %v874_v7 = vpop.xlane.xlu1 %873  ;;  %v871_v63 = vpop.xlane.xlu0 %870  ;;  %v285_v51 = vld [vmem:[%s2381_s11 + $0x2c] sm:$0xf] }
 0x187   : > { %v894_v1 = vsub.f32 %v2317_v13, %v874_v7  ;;  %v893_v8 = vsub.f32 %v2315_v12, %v871_v63  ;;  %v2441_v7 = vsel %vm1023_vm2, %v285_v51, 0 }
 0x188   : > { %v2355_v9 = vpop.eup %2003 }
 0x189   : > { %v913_v10 = vmul.f32 1.442695, %v894_v1  ;;  %v911_v11 = vmul.f32 1.442695, %v893_v8  ;;  %v929_v14 = vsel %vm286_vm1, %v2355_v9, 0.0 }
 0x18a   : > { %930 = vadd.xlane.f32.xlu0 %v929_v14 }
 0x18b   : > { %2011 = vpow2.f32 %v913_v10 }
 0x18c   : > { %v2359_v15 = vpop.eup %2005  ;;  %2013 = vpow2.f32 %v911_v11 }
 0x18d   : > { %v932_v16 = vsel %vm286_vm1, %v2359_v15, 0.0 }
 0x18e   : > { %933 = vadd.xlane.f32.xlu1 %v932_v16  ;;  %v880_v17 = vpop.xlane.xlu1 %879  ;;  %v877_v13 = vpop.xlane.xlu0 %876 }
 0x18f   : > { %v896_v12 = vsub.f32 %v2325_v25, %v880_v17  ;;  %v895_v18 = vsub.f32 %v2323_v24, %v877_v13 }
 0x190   : > { %v2365_v19 = vpop.eup %2007 }
 0x191   : > { %v2367_v20 = vpop.eup %2009  ;;  %v917_v21 = vmul.f32 1.442695, %v896_v12  ;;  %v915_v22 = vmul.f32 1.442695, %v895_v18  ;;  %v938_v23 = vsel %vm286_vm1, %v2365_v19, 0.0 }
 0x192   : > { %939 = vadd.xlane.f32.xlu1 %v938_v23  ;;  %v935_v26 = vsel %vm286_vm1, %v2367_v20, 0.0 }
 0x193   : > { %2015 = vpow2.f32 %v917_v21  ;;  %936 = vadd.xlane.f32.xlu0 %v935_v26 }
 0x194   : > { %2017 = vpow2.f32 %v915_v22 }
 0x196   : > { %v886_v25 = vpop.xlane.xlu1 %885  ;;  %v883_v27 = vpop.xlane.xlu0 %882 }
 0x197   : > { %v898_v24 = vsub.f32 %v2333_v37, %v886_v25  ;;  %v897_v28 = vsub.f32 %v2331_v36, %v883_v27  ;;  %v275_v36 = vld [vmem:[%s2381_s11 + $0x4] sm:$0xf]  ;;  %v1025_v37 = vsel %vm1023_vm2, %v274_v35, 0 }
 0x198   : > { %v2375_v29 = vpop.eup %2011  ;;  %v1071_v38 = vsel %vm1023_vm2, %v275_v36, 0  ;;  %1886 = vmatpush3.bf16.msra.mxu0 %v1025_v37 }
 0x199   : > { %v2383_v30 = vpop.eup %2013  ;;  %v921_v31 = vmul.f32 1.442695, %v898_v24  ;;  %v919_v32 = vmul.f32 1.442695, %v897_v28  ;;  %v944_v33 = vsel %vm286_vm1, %v2375_v29, 0.0  ;;  %1892 = vmatpush3.bf16.msra.mxu1 %v1071_v38  ;;  %1897 = vmatprep.subr.bf16.mxu0 %v2109_v0 }
 0x19a   : > { %945 = vadd.xlane.f32.xlu1 %v944_v33  ;;  %v941_v34 = vsel %vm286_vm1, %v2383_v30, 0.0  ;;  %1903 = vmatprep.subr.bf16.mxu1 %v2109_v0 }
 0x19b   : > { %2019 = vpow2.f32 %v921_v31  ;;  %942 = vadd.xlane.f32.xlu0 %v941_v34 }
 0x19c   : > { %2021 = vpow2.f32 %v919_v32 }
 0x1a0   : > { %v2395_v41 = vpop.eup %2015 }
 0x1a1   : > { %v2397_v42 = vpop.eup %2017  ;;  %v950_v43 = vsel %vm286_vm1, %v2395_v41, 0.0 }
 0x1a2   : > { %951 = vadd.xlane.f32.xlu1 %v950_v43  ;;  %v947_v44 = vsel %vm286_vm1, %v2397_v42, 0.0 }
 0x1a3   : > { %948 = vadd.xlane.f32.xlu0 %v947_v44 }
 0x1a8   : > { %v2407_v49 = vpop.eup %2019 }
 0x1a9   : > { %v2409_v50 = vpop.eup %2021  ;;  %v956_v53 = vsel %vm286_vm1, %v2407_v49, 0.0 }
 0x1aa   : > { %957 = vadd.xlane.f32.xlu1 %v956_v53  ;;  %v953_v54 = vsel %vm286_vm1, %v2409_v50, 0.0 }
 0x1ab   : > { %954 = vadd.xlane.f32.xlu0 %v953_v54 }
 0x20b   : > { %v925_v63 = vpop.xlane.xlu0 %924 }
 0x20c   : > { %2023 = vrcp.f32 %v925_v63 }
 0x20f   : > { %v928_v1 = vpop.xlane.xlu1 %927 }
 0x210   : > { %2025 = vrcp.f32 %v928_v1 }
 0x213   : > { %v931_v8 = vpop.xlane.xlu0 %930 }
 0x214   : > { %2027 = vrcp.f32 %v931_v8 }
 0x217   : > { %v934_v10 = vpop.xlane.xlu1 %933 }
 0x218   : > { %2029 = vrcp.f32 %v934_v10 }
 0x219   : > { %v2024_v11 = vpop.eup %2023 }
 0x21a   : > { %v960_v14 = vmul.f32 %v2024_v11, %v2345_v4 }
 0x21b   : > { %v940_v16 = vpop.xlane.xlu1 %939 }
 0x21c   : > { %2031 = vrcp.f32 %v940_v16  ;;  %v937_v17 = vpop.xlane.xlu0 %936  ;;  %v1008_v13 = vpack.c.bf16 %v960_v14, %v960_v14  ;;  %v983_v35 = vsel %vm286_vm1, %v960_v14, 0.0 }
 0x21d   : > { %v2026_v12 = vpop.eup %2025  ;;  %2033 = vrcp.f32 %v937_v17 }
 0x21e   : > { %1888 = vmatmul.mubr.msk.bf16.vlgmr.msra.gmra.mxu0 %vm286_vm1, %v1008_v13  ;;  %v962_v18 = vmul.f32 %v2026_v12, %v2349_v6 }
 0x21f   : > { %1898 = vmatpush3.bf16.msra.mxu0 %v1117_v48  ;;  %1899 = vmatprep.mubr.msk.bf16.mxu0 %vm2110_vm0, %v2109_v0 }
 0x220   : > { %v1009_v21 = vpack.c.bf16 %v962_v18, %v962_v18  ;;  %1909 = vmatprep.subr.bf16.mxu0 %v2109_v0  ;;  %v984_v31 = vsel %vm286_vm1, %v962_v18, 0.0 }
 0x221   : > { %v2028_v22 = vpop.eup %2027  ;;  %v985_v38 = vadd.f32 %v984_v31, %v983_v35 }
 0x222   : > { %1894 = vmatmul.mubr.msk.bf16.vlgmr.msra.gmra.mxu1 %vm286_vm1, %v1009_v21  ;;  %v964_v4 = vmul.f32 %v2028_v22, %v2355_v9 }
 0x223   : > { %1904 = vmatpush3.bf16.msra.mxu1 %v1163_v47  ;;  %v946_v23 = vpop.xlane.xlu1 %945  ;;  %1905 = vmatprep.mubr.msk.bf16.mxu1 %vm2110_vm0, %v2109_v0 }
 0x224   : > { %2035 = vrcp.f32 %v946_v23  ;;  %v943_v26 = vpop.xlane.xlu0 %942  ;;  %v1010_v6 = vpack.c.bf16 %v964_v4, %v964_v4  ;;  %1915 = vmatprep.subr.bf16.mxu1 %v2109_v0  ;;  %v986_v36 = vsel %vm286_vm1, %v964_v4, 0.0 }
 0x225   : > { %v2030_v25 = vpop.eup %2029  ;;  %2037 = vrcp.f32 %v943_v26 }
 0x226   : > { %1900 = vmatmul.mubr.msk.bf16.vlgmr.msra.gmra.mxu0 %vm286_vm1, %v1010_v6  ;;  %v966_v27 = vmul.f32 %v2030_v25, %v2359_v15 }
 0x227   : > { %1910 = vmatpush3.bf16.msra.mxu0 %v1209_v58  ;;  %1911 = vmatprep.mubr.msk.bf16.mxu0 %vm2110_vm0, %v2109_v0 }
 0x228   : > { %v1011_v9 = vpack.c.bf16 %v966_v27, %v966_v27  ;;  %1921 = vmatprep.subr.bf16.mxu0 %v2109_v0  ;;  %v988_v43 = vsel %vm286_vm1, %v966_v27, 0.0 }
 0x229   : > { %v2032_v24 = vpop.eup %2031 }
 0x22a   : > { %v2034_v28 = vpop.eup %2033  ;;  %1906 = vmatmul.mubr.msk.bf16.vlgmr.msra.gmra.mxu1 %vm286_vm1, %v1011_v9  ;;  %v970_v34 = vmul.f32 %v2032_v24, %v2365_v19 }
 0x22b   : > { %1916 = vmatpush3.bf16.msra.mxu1 %v1255_v57  ;;  %v952_v32 = vpop.xlane.xlu1 %951  ;;  %v968_v33 = vmul.f32 %v2034_v28, %v2367_v20  ;;  %1917 = vmatprep.mubr.msk.bf16.mxu1 %vm2110_vm0, %v2109_v0  ;;  %v987_v20 = vadd.f32 %v986_v36, %v985_v38 }
 0x22c   : > { %2039 = vrcp.f32 %v952_v32  ;;  %v949_v15 = vpop.xlane.xlu0 %948  ;;  %1927 = vmatprep.subr.bf16.mxu1 %v2109_v0  ;;  %v1013_v44 = vpack.c.bf16 %v970_v34, %v970_v34  ;;  %v992_v58 = vsel %vm286_vm1, %v970_v34, 0.0 }
 0x22d   : > { %2041 = vrcp.f32 %v949_v15  ;;  %v1012_v37 = vpack.c.bf16 %v968_v33, %v968_v33  ;;  %v990_v45 = vsel %vm286_vm1, %v968_v33, 0.0  ;;  %v989_v47 = vadd.f32 %v988_v43, %v987_v20 }
 0x22f   : > { %1912 = vmatmul.mubr.msk.bf16.vlgmr.msra.gmra.mxu0 %vm286_vm1, %v1012_v37  ;;  %v991_v54 = vadd.f32 %v990_v45, %v989_v47 }
 0x230   : > { %1922 = vmatpush3.bf16.msra.mxu0 %v2425_v62  ;;  %1923 = vmatprep.mubr.msk.bf16.mxu0 %vm2110_vm0, %v2109_v0 }
 0x231   : > { %v2036_v19 = vpop.eup %2035  ;;  %1933 = vmatprep.subr.bf16.mxu0 %v2109_v0  ;;  %v993_v60 = vadd.f32 %v992_v58, %v991_v54 }
 0x232   : > { %v2038_v46 = vpop.eup %2037  ;;  %1918 = vmatmul.mubr.msk.bf16.vlgmr.msra.gmra.mxu1 %vm286_vm1, %v1013_v44  ;;  %v974_v56 = vmul.f32 %v2036_v19, %v2375_v29 }
 0x233   : > { %1928 = vmatpush3.bf16.msra.mxu1 %v2422_v61  ;;  %v958_v48 = vpop.xlane.xlu1 %957  ;;  %v972_v53 = vmul.f32 %v2038_v46, %v2383_v30  ;;  %1929 = vmatprep.mubr.msk.bf16.mxu1 %vm2110_vm0, %v2109_v0 }
 0x234   : > { %2043 = vrcp.f32 %v958_v48  ;;  %v955_v55 = vpop.xlane.xlu0 %954  ;;  %1939 = vmatprep.subr.bf16.mxu1 %v2109_v0  ;;  %v1015_v30 = vpack.c.bf16 %v974_v56, %v974_v56 }
 0x235   : > { %2045 = vrcp.f32 %v955_v55  ;;  %v1014_v57 = vpack.c.bf16 %v972_v53, %v972_v53  ;;  %v994_v59 = vsel %vm286_vm1, %v972_v53, 0.0 }
 0x236   : > { %v995_v62 = vadd.f32 %v994_v59, %v993_v60 }
 0x237   : > { %1924 = vmatmul.mubr.msk.bf16.vlgmr.msra.gmra.mxu0 %vm286_vm1, %v1014_v57 }
 0x238   : > { %1934 = vmatpush3.bf16.msra.mxu0 %v2429_v39  ;;  %1935 = vmatprep.mubr.msk.bf16.mxu0 %vm2110_vm0, %v2109_v0  ;;  %v996_v39 = vsel %vm286_vm1, %v974_v56, 0.0 }
 0x239   : > { %v2040_v61 = vpop.eup %2039  ;;  %1945 = vmatprep.subr.bf16.mxu0 %v2109_v0  ;;  %v997_v63 = vadd.f32 %v996_v39, %v995_v62 }
 0x23a   : > { %v2042_v29 = vpop.eup %2041  ;;  %1930 = vmatmul.mubr.msk.bf16.vlgmr.msra.gmra.mxu1 %vm286_vm1, %v1015_v30  ;;  %v978_v3 = vmul.f32 %v2040_v61, %v2395_v41 }
 0x23b   : > { %1940 = vmatpush3.bf16.msra.mxu1 %v2433_v40  ;;  %v976_v2 = vmul.f32 %v2042_v29, %v2397_v42  ;;  %1941 = vmatprep.mubr.msk.bf16.mxu1 %vm2110_vm0, %v2109_v0 }
 0x23c   : > { %1951 = vmatprep.subr.bf16.mxu1 %v2109_v0  ;;  %v1017_v1 = vpack.c.bf16 %v978_v3, %v978_v3 }
 0x23d   : > { %v1016_v5 = vpack.c.bf16 %v976_v2, %v976_v2  ;;  %v998_v51 = vsel %vm286_vm1, %v976_v2, 0.0 }
 0x23e   : > { %v999_v42 = vadd.f32 %v998_v51, %v997_v63 }
 0x23f   : > { %1936 = vmatmul.mubr.msk.bf16.vlgmr.msra.gmra.mxu0 %vm286_vm1, %v1016_v5 }
 0x240   : > { %1946 = vmatpush3.bf16.msra.mxu0 %v2437_v52  ;;  %1947 = vmatprep.mubr.msk.bf16.mxu0 %vm2110_vm0, %v2109_v0  ;;  %v1000_v52 = vsel %vm286_vm1, %v978_v3, 0.0 }
 0x241   : > { %v2044_v40 = vpop.eup %2043  ;;  %v1001_v11 = vadd.f32 %v1000_v52, %v999_v42 }
 0x242   : > { %v2046_v41 = vpop.eup %2045  ;;  %1942 = vmatmul.mubr.msk.bf16.vlgmr.msra.gmra.mxu1 %vm286_vm1, %v1017_v1  ;;  %v982_v8 = vmul.f32 %v2044_v40, %v2407_v49 }
 0x243   : > { %v980_v10 = vmul.f32 %v2046_v41, %v2409_v50  ;;  %1952 = vmatpush3.bf16.msra.mxu1 %v2441_v7  ;;  %1953 = vmatprep.mubr.msk.bf16.mxu1 %vm2110_vm0, %v2109_v0 }
 0x244   : > { %v1004_v49 = vsel %vm286_vm1, %v982_v8, 0.0  ;;  %v1019_v50 = vpack.c.bf16 %v982_v8, %v982_v8 }
 0x245   : > { %v1018_v14 = vpack.c.bf16 %v980_v10, %v980_v10  ;;  %v1002_v16 = vsel %vm286_vm1, %v980_v10, 0.0 }
 0x246   : > { %v1003_v17 = vadd.f32 %v1002_v16, %v1001_v11 }
 0x247   : > { %1948 = vmatmul.mubr.msk.bf16.vlgmr.msra.gmra.mxu0 %vm286_vm1, %v1018_v14 }
 0x248   : > { %v1005_v7 = vadd.f32 %v1004_v49, %v1003_v17 }
 0x24a   : > { %1954 = vmatmul.mubr.msk.bf16.vlgmr.msra.gmra.mxu1 %vm286_vm1, %v1019_v50  ;;  %v1006_v0 = vmul.f32 0.083333336, %v1005_v7 }
 0x24c   : > { %1007 = vst.msk [vmem:[%s228_s14] sm:$0xff] %vm286_vm1, %v1006_v0 }
 0x24d   : > { %2060 = shalt.err (!%p2057_p3)
}
 0x24e   : > { %s2061_s19 = scalar_lea.hbm %s1618_s29, 128  ;;  %s2065_s11 = scalar_lea.hbm %s2582_s4, 256 }
 0x24f   : > { %p2062_p4 = scmp.ne.s32.totalorder %s1618_s29, %s2061_s19  ;;  %p2066_p9 = scmp.lt.s32.totalorder %s1618_s29, %s2582_s4 }
 0x250   : > { %p2067_p10 = scmp.lt.s32.totalorder %s2065_s11, %s2061_s19 }
 0x251   : > { %p2063_p7 = pnand %p2062_p4, %p2175_p5 }
 0x252   : > { %p2068_p11 = por %p2067_p10, %p2066_p9 }
 0x253   : > { %p2064_p8 = pneg %p2063_p7 }
 0x255   : > { %p2069_p12 = pnand %p2068_p11, %p2064_p8 }
 0x257   : > { %2072 = shalt.err (!%p2069_p12)
}
 0x258   : > { %1958 = dma.vmem_to_hbm [thread:$0]  (%p2175_p5), %s1621_s22, 128, %s1618_s29, %s1604_s30   ;;  %vm1585_vm3 = vcmask 60416  }
 0x259   : > { %s2535_s23 = scalar_lea.vmem %s2581_s3, %s2193_s28 }
 0x2de   : > { %v1061_v13 = vpop.f32.mrf.mxu0 }
 0x2df   : > { %v1573_v12 = vpack.c.bf16 %v1061_v13, %v1061_v13 }
 0x2e0   : > { %v1889_v18 = vpop.f32.mrf.mxu0 }
 0x2e1   : > { %1586 = vst.msk [vmem:[%s2535_s23] sm:$0xf] %vm1585_vm3, %v1573_v12 }
 0x2e2   : > { %v1064_v21 = vpop.f32.mrf.mxu0  ;;  %v1107_v22 = vpop.f32.mrf.mxu1 }
 0x2e3   : > { %v1574_v4 = vpack.c.bf16 %v1107_v22, %v1107_v22 }
 0x2e4   : > { %v1890_v23 = vpop.f32.mrf.mxu0  ;;  %v1895_v26 = vpop.f32.mrf.mxu1 }
 0x2e5   : > { %1587 = vst.msk [vmem:[%s2535_s23 + $0x4] sm:$0xf] %vm1585_vm3, %v1574_v4 }
 0x2e6   : > { %v1110_v6 = vpop.f32.mrf.mxu1  ;;  %v1153_v25 = vpop.f32.mrf.mxu0 }
 0x2e7   : > { %v1575_v27 = vpack.c.bf16 %v1153_v25, %v1153_v25 }
 0x2e8   : > { %v1896_v9 = vpop.f32.mrf.mxu1  ;;  %v1901_v24 = vpop.f32.mrf.mxu0 }
 0x2e9   : > { %1588 = vst.msk [vmem:[%s2535_s23 + $0x8] sm:$0xf] %vm1585_vm3, %v1575_v27 }
 0x2ea   : > { %v1156_v28 = vpop.f32.mrf.mxu0  ;;  %v1199_v31 = vpop.f32.mrf.mxu1 }
 0x2eb   : > { %v1576_v32 = vpack.c.bf16 %v1199_v31, %v1199_v31 }
 0x2ec   : > { %v1902_v33 = vpop.f32.mrf.mxu0  ;;  %v1907_v15 = vpop.f32.mrf.mxu1 }
 0x2ed   : > { %1589 = vst.msk [vmem:[%s2535_s23 + $0xc] sm:$0xf] %vm1585_vm3, %v1576_v32 }
 0x2ee   : > { %v1202_v34 = vpop.f32.mrf.mxu1 }
 0x2ef   : > { %v1245_v35 = vpop.f32.mrf.mxu0 }
 0x2f0   : > { %v1577_v36 = vpack.c.bf16 %v1245_v35, %v1245_v35  ;;  %v1908_v37 = vpop.f32.mrf.mxu1 }
 0x2f1   : > { %v1913_v38 = vpop.f32.mrf.mxu0 }
 0x2f2   : > { %1590 = vst.msk [vmem:[%s2535_s23 + $0x10] sm:$0xf] %vm1585_vm3, %v1577_v36  ;;  %v1291_v43 = vpop.f32.mrf.mxu1 }
 0x2f3   : > { %v1248_v20 = vpop.f32.mrf.mxu0  ;;  %v1578_v44 = vpack.c.bf16 %v1291_v43, %v1291_v43 }
 0x2f4   : > { %v1919_v19 = vpop.f32.mrf.mxu1 }
 0x2f5   : > { %1591 = vst.msk [vmem:[%s2535_s23 + $0x14] sm:$0xf] %vm1585_vm3, %v1578_v44  ;;  %v1914_v45 = vpop.f32.mrf.mxu0 }
 0x2f6   : > { %v1294_v46 = vpop.f32.mrf.mxu1 }
 0x2f7   : > { %v1337_v47 = vpop.f32.mrf.mxu0 }
 0x2f8   : > { %v1579_v48 = vpack.c.bf16 %v1337_v47, %v1337_v47  ;;  %v1920_v53 = vpop.f32.mrf.mxu1 }
 0x2f9   : > { %v1925_v54 = vpop.f32.mrf.mxu0 }
 0x2fa   : > { %1592 = vst.msk [vmem:[%s2535_s23 + $0x18] sm:$0xf] %vm1585_vm3, %v1579_v48  ;;  %v1383_v55 = vpop.f32.mrf.mxu1 }
 0x2fb   : > { %v1340_v56 = vpop.f32.mrf.mxu0  ;;  %v1580_v57 = vpack.c.bf16 %v1383_v55, %v1383_v55 }
 0x2fc   : > { %v1931_v58 = vpop.f32.mrf.mxu1 }
 0x2fd   : > { %1593 = vst.msk [vmem:[%s2535_s23 + $0x1c] sm:$0xf] %vm1585_vm3, %v1580_v57  ;;  %v1926_v59 = vpop.f32.mrf.mxu0 }
 0x2fe   : > { %v1386_v60 = vpop.f32.mrf.mxu1 }
 0x2ff   : > { %v1429_v30 = vpop.f32.mrf.mxu0 }
 0x300   : > { %v1581_v61 = vpack.c.bf16 %v1429_v30, %v1429_v30  ;;  %v1932_v29 = vpop.f32.mrf.mxu1 }
 0x301   : > { %v1937_v62 = vpop.f32.mrf.mxu0 }
 0x302   : > { %1594 = vst.msk [vmem:[%s2535_s23 + $0x20] sm:$0xf] %vm1585_vm3, %v1581_v61  ;;  %v1475_v2 = vpop.f32.mrf.mxu1 }
 0x303   : > { %v1432_v3 = vpop.f32.mrf.mxu0  ;;  %v1582_v39 = vpack.c.bf16 %v1475_v2, %v1475_v2 }
 0x304   : > { %v1943_v5 = vpop.f32.mrf.mxu1 }
 0x305   : > { %1595 = vst.msk [vmem:[%s2535_s23 + $0x24] sm:$0xf] %vm1585_vm3, %v1582_v39  ;;  %v1938_v51 = vpop.f32.mrf.mxu0 }
 0x306   : > { %v1478_v63 = vpop.f32.mrf.mxu1 }
 0x307   : > { %v1521_v1 = vpop.f32.mrf.mxu0 }
 0x308   : > { %v1583_v42 = vpack.c.bf16 %v1521_v1, %v1521_v1  ;;  %v1944_v40 = vpop.f32.mrf.mxu1 }
 0x309   : > { %v1949_v41 = vpop.f32.mrf.mxu0 }
 0x30a   : > { %1596 = vst.msk [vmem:[%s2535_s23 + $0x28] sm:$0xf] %vm1585_vm3, %v1583_v42  ;;  %v1567_v8 = vpop.f32.mrf.mxu1 }
 0x30b   : > { %v1524_v10 = vpop.f32.mrf.mxu0  ;;  %v1584_v52 = vpack.c.bf16 %v1567_v8, %v1567_v8 }
 0x30c   : > { %v1955_v11 = vpop.f32.mrf.mxu1 }
 0x30d   : > { %1597 = vst.msk [vmem:[%s2535_s23 + $0x2c] sm:$0xf] %vm1585_vm3, %v1584_v52  ;;  %v1950_v14 = vpop.f32.mrf.mxu0 }
 0x30e   : > { %v1570_v16 = vpop.f32.mrf.mxu1 }
 0x310   : > { %v1956_v17 = vpop.f32.mrf.mxu1 }
 0x311 PF: > { %p1964_p5 = scmp.ge.s32.totalorder %s2107_s18, 2  ;;  %s1640_s25 = sand.u32 1, %s2095_s15  }
 0x312   : > { %s1641_s28 = scalar_lea.sflag [#allocation3], %s1640_s25 }
 0x313   : > { %p1961_p13 = pnand %p1964_p5, %p2179_p6 }
 0x315   : > { %p1962_p0 = pneg %p1961_p13 }
 0x317   : > { %2090 = dma.done.wait (%p1962_p0), %s1641_s28, 128  }
 0x318   : > { %2092 = vsyncadd (%p1962_p0), %s1641_s28, 4294967168  ;;  %p15_p1 = scmp.ge.s32.totalorder %s2162_s21, 4   ;;  %s2585_s15 = smov %s2099_s16 }
 0x319   : > { %s2586_s16 = smov %s2103_s17  ;;  %s2587_s17 = smov %s2173_s24 }
 0x31a   : > { %s2588_s18 = smov %s2162_s21  ;;  %17 = sbr.rel (!%p15_p1) target bundleno = 3 (0x3), region = 85 }
 0x31f   :  { %1646 = vsyncpa [#allocation3], 1 }
 0x320   :  { %1648 = vsyncpa [#allocation3 + $0x1], 1 }

// kernel: block_forward.5
= control target key start
LH: loop header
LB: loop body
LE: loop exit
PB: predicated region body
PF: predicated region fallthrough
CT: control target
= control target key end

     0   :  { %v1143_v1 = vmov 0.0   ;;  %vm1144_vm0 = vmmov 0   ;;  %vm99_vm1 = vcmask 785408   ;;  %s1481_s0 = inlined_call_operand.vmem [shape: bf16[16,96], index: 0, kind: input, shape index: {}]   ;;  %s1482_s1 = inlined_call_operand.vmem [shape: f32[16,96], index: 1, kind: input, shape index: {}]   ;;  %s1483_s2 = inlined_call_operand.vmem [shape: bf16[96,96], index: 2, kind: input, shape index: {}]   ;;  %s1484_s3 = inlined_call_operand.vmem [shape: f32[1,96], index: 3, kind: input, shape index: {}]   ;;  %s1485_s4 = inlined_call_operand.vmem [shape: f32[1,96], index: 4, kind: input, shape index: {}]   ;;  %s1486_s5 = inlined_call_operand.vmem [shape: f32[1,96], index: 5, kind: input, shape index: {}]   ;;  %s1487_s6 = inlined_call_operand.vmem [shape: bf16[96,384], index: 6, kind: input, shape index: {}]   ;;  %s1488_s7 = inlined_call_operand.vmem [shape: f32[1,384], index: 7, kind: input, shape index: {}]   ;;  %s1489_s8 = inlined_call_operand.vmem [shape: bf16[384,96], index: 8, kind: input, shape index: {}]   ;;  %s1490_s9 = inlined_call_operand.vmem [shape: f32[1,96], index: 9, kind: input, shape index: {}]   ;;  %s1491_s10 = inlined_call_operand.hbm [shape: f32[16,96], index: 10, kind: output, shape index: {}]  }
   0x1   :  { %v1038_v0 = vld [vmem:[%s1483_s2 + $0x28] sm:$0xff]   ;;  %979 = vmatprep.subr.bf16.mxu0 %v1143_v1  ;;  %v1039_v2 = vld [vmem:[%s1483_s2 + $0x20] sm:$0xff]   ;;  %991 = vmatprep.mubr.msk.bf16.mxu0 %vm1144_vm0, %v1143_v1  ;;  %v1040_v3 = vld [vmem:[%s1483_s2 + $0x18] sm:$0xff]  }
   0x2   :  { %980 = vmatpush3.bf16.msra.mxu0 %v1038_v0  ;;  %v1041_v4 = vld [vmem:[%s1483_s2 + $0x10] sm:$0xff]   ;;  %v1042_v5 = vld [vmem:[%s1483_s2 + $0x8] sm:$0xff]   ;;  %v1043_v6 = vld [vmem:[%s1483_s2] sm:$0xff]  }
   0x3   :  { %981 = vmatprep.subr.bf16.mxu0 %v1143_v1  ;;  %v1044_v7 = vld [vmem:[%s1481_s0] sm:$0xff]  }
   0x6   :  { %982 = vmatpush3.bf16.msra.mxu0 %v1039_v2 }
   0x7   :  { %983 = vmatprep.subr.bf16.mxu0 %v1143_v1 }
   0xa   :  { %984 = vmatpush3.bf16.msra.mxu0 %v1040_v3 }
   0xb   :  { %985 = vmatprep.subr.bf16.mxu0 %v1143_v1 }
   0xe   :  { %986 = vmatpush3.bf16.msra.mxu0 %v1041_v4 }
   0xf   :  { %987 = vmatprep.subr.bf16.mxu0 %v1143_v1 }
  0x12   :  { %988 = vmatpush3.bf16.msra.mxu0 %v1042_v5 }
  0x13   :  { %989 = vmatprep.subr.bf16.mxu0 %v1143_v1 }
  0x16   :  { %990 = vmatpush3.bf16.msra.mxu0 %v1043_v6 }
  0x17   :  { %995 = vmatprep.subr.bf16.mxu0 %v1143_v1 }
  0x19   :  { %992 = vmatmul.mubr.msk.bf16.vlgmr.msra.gmra.mxu0 %vm99_vm1, %v1044_v7 }
  0x1a   :  { %1007 = vmatprep.mubr.msk.bf16.mxu0 %vm1144_vm0, %v1143_v1 }
  0x1b   :  { %15 = vsyncpa [#allocation3], 0  ;;  %v878_v8 = vld [vmem:[%s1484_s3] ss:$0 sm:$0xff]  ;;  %v145_v15 = vld [vmem:[%s1482_s1 + $0x8] sm:$0xff]  ;;  %v1145_v41 = vmov 0  }
  0x1c   :  { %v144_v10 = vld [vmem:[%s1482_s1] sm:$0xff]  ;;  %v1045_v31 = vld [vmem:[%s1487_s6 + $0x7c] ss:$12 sps:$4 sm:$0xff]   ;;  %v1053_v37 = vld [vmem:[%s1487_s6 + $0x4c] ss:$12 sps:$4 sm:$0xff]   ;;  %366 = vmatprep.mubr.bf16.mxu1 %v1145_v41  ;;  %s1147_s21 = smov [#allocation2]  }
  0x1d   :  { %v1047_v32 = vld [vmem:[%s1487_s6 + $0x78] ss:$12 sps:$4 sm:$0xff]   ;;  %v1048_v33 = vld [vmem:[%s1487_s6 + $0x80] ss:$12 sps:$4 sm:$0xff]   ;;  %338 = vmatprep.subr.bf16.mxu1 %v1045_v31  ;;  %v1052_v36 = vld [vmem:[%s1487_s6 + $0x68] ss:$12 sps:$4 sm:$0xff]  }
  0x1e   :  { %339 = vmatpush1.bf16.msra.mxu1 %v1047_v32  ;;  %996 = vmatpush3.bf16.msra.mxu0 %v1048_v33  ;;  %v1049_v34 = vld [vmem:[%s1487_s6 + $0x64] ss:$12 sps:$4 sm:$0xff]   ;;  %v1051_v35 = vld [vmem:[%s1487_s6 + $0x60] ss:$12 sps:$4 sm:$0xff]   ;;  %v1055_v38 = vld [vmem:[%s1487_s6 + $0x48] ss:$12 sps:$4 sm:$0xff]  }
  0x1f   :  { %997 = vmatprep.subr.bf16.mxu0 %v1143_v1  ;;  %340 = vmatprep.subr.bf16.mxu1 %v1049_v34  ;;  %v1056_v39 = vld [vmem:[%s1487_s6 + $0x50] ss:$12 sps:$4 sm:$0xff]   ;;  %v1057_v40 = vld [vmem:[%s1487_s6 + $0x34] ss:$12 sps:$4 sm:$0xff]   ;;  %v1060_v43 = vld [vmem:[%s1487_s6 + $0x38] ss:$12 sps:$4 sm:$0xff]  }
  0x20   :  { %v1059_v42 = vld [vmem:[%s1487_s6 + $0x30] ss:$12 sps:$4 sm:$0xff]   ;;  %v1063_v45 = vld [vmem:[%s1487_s6 + $0x18] ss:$12 sps:$4 sm:$0xff]   ;;  %v1064_v46 = vld [vmem:[%s1487_s6 + $0x20] ss:$12 sps:$4 sm:$0xff]  }
  0x21   :  { %v1061_v44 = vld [vmem:[%s1487_s6 + $0x1c] ss:$12 sps:$4 sm:$0xff]   ;;  %v1065_v47 = vld [vmem:[%s1487_s6 + $0x4] ss:$12 sps:$4 sm:$0xff]   ;;  %v1067_v48 = vld [vmem:[%s1487_s6] ss:$12 sps:$4 sm:$0xff]  }
  0x22   :  { %341 = vmatpush1.bf16.msra.mxu1 %v1051_v35  ;;  %998 = vmatpush3.bf16.msra.mxu0 %v1052_v36  ;;  %v1068_v49 = vld [vmem:[%s1487_s6 + $0x8] ss:$12 sps:$4 sm:$0xff]   ;;  %v887_v58 = vld [vmem:[%s1485_s4] ss:$0 sm:$0xff]  ;;  %v1069_v4 = vld [vmem:[%s1489_s8 + $0xb8] sm:$0xff]   ;;  %s867_s6 = sshll.u32 %s1147_s21, 4  ;;  %s868_s6 = int_to_ptr.vmem [resolvable:$true] %s867_s6 }
  0x23   :  { %342 = vmatprep.subr.bf16.mxu1 %v1053_v37  ;;  %999 = vmatprep.subr.bf16.mxu0 %v1143_v1  ;;  %v888_v62 = vld [vmem:[%s1486_s5] ss:$0 sm:$0xff]  ;;  %v1070_v5 = vld [vmem:[%s1489_s8 + $0x78] sm:$0xff]   ;;  %v1072_v7 = vld [vmem:[%s1489_s8 + $0xb0] sm:$0xff]   ;;  %p1126_p1 = scmp.lt.s32.totalorder %s868_s6, %s868_s6 }
  0x24   :  { %v1071_v6 = vld [vmem:[%s1489_s8 + $0x38] sm:$0xff]   ;;  %v218_v33 = vld [vmem:[%s1488_s7] sm:$0x7] }
  0x26   :  { %343 = vmatpush1.bf16.msra.mxu1 %v1055_v38  ;;  %1000 = vmatpush3.bf16.msra.mxu0 %v1056_v39 }
  0x27   :  { %344 = vmatprep.subr.bf16.mxu1 %v1057_v40  ;;  %1001 = vmatprep.subr.bf16.mxu0 %v1143_v1 }
  0x2a   :  { %345 = vmatpush1.bf16.msra.mxu1 %v1059_v42  ;;  %1002 = vmatpush3.bf16.msra.mxu0 %v1060_v43 }
  0x2b   :  { %346 = vmatprep.subr.bf16.mxu1 %v1061_v44  ;;  %1003 = vmatprep.subr.bf16.mxu0 %v1143_v1 }
  0x2e   :  { %347 = vmatpush1.bf16.msra.mxu1 %v1063_v45  ;;  %1004 = vmatpush3.bf16.msra.mxu0 %v1064_v46 }
  0x2f   :  { %348 = vmatprep.subr.bf16.mxu1 %v1065_v47  ;;  %1005 = vmatprep.subr.bf16.mxu0 %v1143_v1 }
  0x32   :  { %349 = vmatpush1.bf16.msra.mxu1 %v1067_v48  ;;  %1006 = vmatpush3.bf16.msra.mxu0 %v1068_v49 }
  0x33   :  { %1011 = vmatprep.subr.bf16.mxu0 %v1143_v1  ;;  %948 = vmatprep.subr.bf16.mxu1 %v1070_v5 }
  0xd9   :  { %v137_v9 = vpop.f32.mrf.mxu0 }
  0xda   :  { %v138_v11 = vadd.f32 %v878_v8, %v137_v9  ;;  %v1074_v9 = vld [vmem:[%s1489_s8 + $0x30] sm:$0xff]  }
  0xdb   :  { %v993_v12 = vpop.f32.mrf.mxu0 }
  0xdc   :  { %v1244_v13 = vadd.f32 %v144_v10, %v138_v11  ;;  %v1075_v10 = vld [vmem:[%s1489_s8 + $0xa8] sm:$0xff]  }
  0xdd   :  { %v140_v14 = vpop.f32.mrf.mxu0  ;;  %v1076_v11 = vld [vmem:[%s1489_s8 + $0x68] sm:$0xff]  }
  0xde   :  { %v141_v16 = vadd.f32 %v878_v8, %v140_v14  ;;  %v150_v17 = vsel %vm99_vm1, %v1244_v13, 0.0  ;;  %v1073_v8 = vld [vmem:[%s1489_s8 + $0x70] sm:$0xff]   ;;  %v1077_v12 = vld [vmem:[%s1489_s8 + $0x28] sm:$0xff]   ;;  %v1078_v14 = vld [vmem:[%s1489_s8 + $0xa0] sm:$0xff]  }
  0xdf   :  { %151 = vadd.xlane.f32.xlu0 %v150_v17  ;;  %v994_v18 = vpop.f32.mrf.mxu0  ;;  %v1081_v17 = vld [vmem:[%s1489_s8 + $0x98] sm:$0xff]  }
  0xe0   :  { %v1251_v19 = vadd.f32 %v145_v15, %v141_v16  ;;  %v1079_v15 = vld [vmem:[%s1489_s8 + $0x60] sm:$0xff]   ;;  %v1082_v18 = vld [vmem:[%s1489_s8 + $0x58] sm:$0xff]  }
  0xe1   :  { %v1080_v16 = vld [vmem:[%s1489_s8 + $0x20] sm:$0xff]  }
  0xe2   :  { %v153_v20 = vsel %vm99_vm1, %v1251_v19, 0.0 }
  0xe3   :  { %154 = vadd.xlane.f32.xlu0 %v153_v20  ;;  %v1083_v20 = vld [vmem:[%s1489_s8 + $0x18] sm:$0xff]  }
 0x168   :  { %v152_v21 = vpop.xlane.xlu0 %151 }
 0x169   :  { %v157_v22 = vmul.f32 0.010416667, %v152_v21  ;;  %v1084_v21 = vld [vmem:[%s1489_s8 + $0x90] sm:$0xff]  }
 0x16b   :  { %v1256_v23 = vsub.f32 %v1244_v13, %v157_v22  ;;  %v1085_v22 = vld [vmem:[%s1489_s8 + $0x50] sm:$0xff]  }
 0x16c   :  { %v155_v24 = vpop.xlane.xlu0 %154 }
 0x16d   :  { %v158_v25 = vmul.f32 0.010416667, %v155_v24  ;;  %v161_v26 = vmul.f32 %v1256_v23, %v1256_v23  ;;  %v1087_v24 = vld [vmem:[%s1489_s8 + $0x88] sm:$0xff]  }
 0x16f   :  { %v160_v27 = vsub.f32 %v1251_v19, %v158_v25  ;;  %v163_v28 = vsel %vm99_vm1, %v161_v26, 0.0  ;;  %v1088_v25 = vld [vmem:[%s1489_s8 + $0x48] sm:$0xff]  }
 0x170   :  { %164 = vadd.xlane.f32.xlu1 %v163_v28  ;;  %v1089_v26 = vld [vmem:[%s1489_s8 + $0x8] sm:$0xff]   ;;  %v1091_v28 = vld [vmem:[%s1489_s8 + $0x40] sm:$0xff]  }
 0x171   :  { %v162_v29 = vmul.f32 %v160_v27, %v160_v27 }
 0x173   :  { %v166_v30 = vsel %vm99_vm1, %v162_v29, 0.0  ;;  %v1092_v29 = vld [vmem:[%s1489_s8] sm:$0xff]  }
 0x174   :  { %167 = vadd.xlane.f32.xlu1 %v166_v30  ;;  %v220_v30 = vlaneseq }
 0x176   :  { %v221_v31 = vshrl.u32 %v220_v30, 7 }
 0x178   :  { %v230_v32 = vsub.s32 2, %v221_v31  ;;  %v226_v34 = vsub.s32 1, %v221_v31 }
 0x17a   :  { %v231_v36 = vrot.slane %v218_v33, %v230_v32  ;;  %v227_v39 = vrot.slane %v218_v33, %v226_v34 }
 0x1f9   :  { %v165_v50 = vpop.xlane.xlu1 %164 }
 0x1fa   :  { %v169_v51 = vmul.f32 0.010416667, %v165_v50 }
 0x1fc   :  { %v171_v52 = vadd.f32 1e-06, %v169_v51 }
 0x1fd   :  { %v168_v53 = vpop.xlane.xlu1 %167 }
 0x1fe   :  { %1093 = vrsqrt.f32 %v171_v52  ;;  %v170_v54 = vmul.f32 0.010416667, %v168_v53 }
 0x200   :  { %v172_v55 = vadd.f32 1e-06, %v170_v54 }
 0x202   :  { %1095 = vrsqrt.f32 %v172_v55 }
 0x20b   :  { %v1094_v56 = vpop.eup %1093 }
 0x20c   :  { %v175_v57 = vmul.f32 %v1094_v56, %v1256_v23  ;;  %v1086_v23 = vld [vmem:[%s1489_s8 + $0x10] sm:$0xff]  }
 0x20e   :  { %v183_v61 = vmul.f32 %v887_v58, %v175_v57 }
 0x20f   :  { %v1096_v59 = vpop.eup %1095 }
 0x210   :  { %v176_v60 = vmul.f32 %v1096_v59, %v160_v27  ;;  %v191_v0 = vadd.f32 %v888_v62, %v183_v61  ;;  %v1090_v27 = vld [vmem:[%s1489_s8 + $0x80] sm:$0xff]  }
 0x212   :  { %v184_v63 = vmul.f32 %v887_v58, %v176_v60 }
 0x214   :  { %v192_v2 = vadd.f32 %v888_v62, %v184_v63 }
 0x216   :  { %v193_v3 = vpack.c.bf16 %v192_v2, %v191_v0 }
 0x218   :  { %907 = vmatmul.mubr.msk.bf16.vlgmr.msra.gmra.mxu1 %vm99_vm1, %v193_v3  ;;  %1008 = vmatmul.mubr.msk.bf16.vlgmr.msra.gmra.mxu0 %vm99_vm1, %v193_v3 }
 0x219   :  { %1027 = vmatprep.mubr.msk.bf16.mxu0 %vm1144_vm0, %v1143_v1  ;;  %1012 = vmatpush3.bf16.msra.mxu0 %v1069_v4 }
 0x21a   :  { %1013 = vmatprep.subr.bf16.mxu0 %v1143_v1  ;;  %949 = vmatpush3.bf16.msra.mxu1 %v1071_v6 }
 0x21b   :  { %950 = vmatprep.subr.bf16.mxu1 %v1073_v8 }
 0x21d   :  { %1014 = vmatpush3.bf16.msra.mxu0 %v1072_v7 }
 0x21e   :  { %1015 = vmatprep.subr.bf16.mxu0 %v1143_v1  ;;  %951 = vmatpush3.bf16.msra.mxu1 %v1074_v9 }
 0x21f   :  { %952 = vmatprep.subr.bf16.mxu1 %v1076_v11 }
 0x221   :  { %1016 = vmatpush3.bf16.msra.mxu0 %v1075_v10 }
 0x222   :  { %1017 = vmatprep.subr.bf16.mxu0 %v1143_v1  ;;  %953 = vmatpush3.bf16.msra.mxu1 %v1077_v12 }
 0x223   :  { %954 = vmatprep.subr.bf16.mxu1 %v1079_v15 }
 0x225   :  { %1018 = vmatpush3.bf16.msra.mxu0 %v1078_v14 }
 0x226   :  { %1019 = vmatprep.subr.bf16.mxu0 %v1143_v1  ;;  %955 = vmatpush3.bf16.msra.mxu1 %v1080_v16 }
 0x227   :  { %956 = vmatprep.subr.bf16.mxu1 %v1082_v18 }
 0x229   :  { %1020 = vmatpush3.bf16.msra.mxu0 %v1081_v17 }
 0x22a   :  { %1021 = vmatprep.subr.bf16.mxu0 %v1143_v1  ;;  %957 = vmatpush3.bf16.msra.mxu1 %v1083_v20 }
 0x22b   :  { %958 = vmatprep.subr.bf16.mxu1 %v1085_v22 }
 0x22d   :  { %1022 = vmatpush3.bf16.msra.mxu0 %v1084_v21 }
 0x22e   :  { %1023 = vmatprep.subr.bf16.mxu0 %v1143_v1  ;;  %959 = vmatpush3.bf16.msra.mxu1 %v1086_v23 }
 0x22f   :  { %960 = vmatprep.subr.bf16.mxu1 %v1088_v25 }
 0x231   :  { %1024 = vmatpush3.bf16.msra.mxu0 %v1087_v24 }
 0x232   :  { %1025 = vmatprep.subr.bf16.mxu0 %v1143_v1  ;;  %961 = vmatpush3.bf16.msra.mxu1 %v1089_v26  ;;  %v222_v1 = vsub.s32 0, %v221_v31 }
 0x233   :  { %962 = vmatprep.subr.bf16.mxu1 %v1091_v28 }
 0x234   :  { %v223_v35 = vrot.slane %v218_v33, %v222_v1 }
 0x235   :  { %1026 = vmatpush3.bf16.msra.mxu0 %v1090_v27 }
 0x236   :  { %963 = vmatpush3.bf16.msra.mxu1 %v1092_v29 }
 0x2d8   :  { %v368_v37 = vpop.f32.mrf.mxu1  ;;  %v411_v38 = vpop.f32.mrf.mxu0 }
 0x2d9   :  { %v1416_v40 = vadd.f32 %v368_v37, %v223_v35  ;;  %v1418_v41 = vadd.f32 %v411_v38, %v231_v36 }
 0x2da   :  { %v370_v42 = vpop.f32.mrf.mxu1  ;;  %v1009_v43 = vpop.f32.mrf.mxu0 }
 0x2db   :  { %v1421_v44 = vmul.f32 0.70710677, %v1416_v40  ;;  %v1424_v45 = vmul.f32 0.70710677, %v1418_v41  ;;  %v1426_v46 = vadd.f32 %v370_v42, %v227_v39 }
 0x2dc   :  { %v414_v47 = vpop.f32.mrf.mxu0  ;;  %v372_v50 = vpop.f32.mrf.mxu1 }
 0x2dd   :  { %v436_v48 = vand.u32 2147483647, %v1421_v44  ;;  %v438_v49 = vand.u32 2147483647, %v1424_v45  ;;  %v1431_v51 = vmul.f32 0.70710677, %v1426_v46  ;;  %v1434_v56 = vadd.f32 %v372_v50, %v223_v35 }
 0x2de   :  { %v1010_v52 = vpop.f32.mrf.mxu0  ;;  %v1436_v59 = vadd.f32 %v414_v47, %v231_v36  ;;  %v374_v62 = vpop.f32.mrf.mxu1  ;;  %vm426_vm2 = vcmp.ge.f32.partialorder %v1424_v45, 0.0  ;;  %vm424_vm3 = vcmp.ge.f32.partialorder %v1421_v44, 0.0 }
 0x2df   :  { %v442_v53 = vmul.f32 0.3275911, %v436_v48  ;;  %v444_v54 = vmul.f32 0.3275911, %v438_v49  ;;  %v437_v55 = vand.u32 2147483647, %v1431_v51  ;;  %v1445_v3 = vadd.f32 %v374_v62, %v227_v39 }
 0x2e0   :  { %v1439_v61 = vmul.f32 0.70710677, %v1434_v56  ;;  %v1443_v2 = vmul.f32 0.70710677, %v1436_v59  ;;  %v516_v10 = vsub.f32 0.0, %v438_v49  ;;  %v514_v15 = vsub.f32 0.0, %v436_v48 }
 0x2e1   :  { %v448_v57 = vadd.f32 1.0, %v442_v53  ;;  %v450_v58 = vadd.f32 1.0, %v444_v54  ;;  %v443_v60 = vmul.f32 0.3275911, %v437_v55  ;;  %v1449_v6 = vmul.f32 0.70710677, %v1445_v3 }
 0x2e2   :  { %v439_v0 = vand.u32 2147483647, %v1439_v61  ;;  %v441_v5 = vand.u32 2147483647, %v1443_v2  ;;  %v522_v17 = vmul.f32 %v516_v10, %v438_v49  ;;  %v515_v18 = vsub.f32 0.0, %v437_v55 }
 0x2e3   :  { %1097 = vrcp.f32 %v448_v57  ;;  %v449_v63 = vadd.f32 1.0, %v443_v60  ;;  %v440_v9 = vand.u32 2147483647, %v1449_v6  ;;  %v520_v26 = vmul.f32 %v514_v15, %v436_v48 }
 0x2e4   :  { %1099 = vrcp.f32 %v450_v58  ;;  %v445_v4 = vmul.f32 0.3275911, %v439_v0  ;;  %v447_v8 = vmul.f32 0.3275911, %v441_v5  ;;  %v517_v22 = vsub.f32 0.0, %v439_v0 }
 0x2e5   :  { %1101 = vrcp.f32 %v449_v63  ;;  %v446_v12 = vmul.f32 0.3275911, %v440_v9  ;;  %v519_v24 = vsub.f32 0.0, %v441_v5  ;;  %v530_v29 = vmul.f32 1.442695, %v522_v17 }
 0x2e6   :  { %v451_v7 = vadd.f32 1.0, %v445_v4  ;;  %v453_v11 = vadd.f32 1.0, %v447_v8  ;;  %v521_v30 = vmul.f32 %v515_v18, %v437_v55  ;;  %v523_v32 = vmul.f32 %v517_v22, %v439_v0 }
 0x2e7   :  { %v452_v14 = vadd.f32 1.0, %v446_v12  ;;  %v525_v34 = vmul.f32 %v519_v24, %v441_v5  ;;  %v526_v36 = vmul.f32 1.442695, %v520_v26  ;;  %v518_v43 = vsub.f32 0.0, %v440_v9 }
 0x2e8   :  { %1103 = vrcp.f32 %v451_v7  ;;  %v528_v42 = vmul.f32 1.442695, %v521_v30  ;;  %v532_v50 = vmul.f32 1.442695, %v523_v32  ;;  %vm425_vm4 = vcmp.ge.f32.partialorder %v1431_v51, 0.0 }
 0x2e9   :  { %1105 = vrcp.f32 %v453_v11  ;;  %v536_v53 = vmul.f32 1.442695, %v525_v34  ;;  %v524_v63 = vmul.f32 %v518_v43, %v440_v9  ;;  %vm427_vm5 = vcmp.ge.f32.partialorder %v1439_v61, 0.0 }
 0x2ea   :  { %1107 = vrcp.f32 %v452_v14  ;;  %vm429_vm6 = vcmp.ge.f32.partialorder %v1443_v2, 0.0  ;;  %vm428_vm7 = vcmp.ge.f32.partialorder %v1449_v6, 0.0  ;;  %v559_v6 = vmul.f32 0.5, %v1434_v56 }
 0x2eb   :  { %1109 = vpow2.f32 %v530_v29  ;;  %v534_v18 = vmul.f32 1.442695, %v524_v63 }
 0x2ec   :  { %1111 = vpow2.f32 %v526_v36 }
 0x2ed   :  { %1113 = vpow2.f32 %v528_v42 }
 0x2ee   :  { %1115 = vpow2.f32 %v532_v50 }
 0x2ef   :  { %1117 = vpow2.f32 %v536_v53 }
 0x2f0   :  { %v1452_v16 = vpop.eup %1097  ;;  %1119 = vpow2.f32 %v534_v18 }
 0x2f1   :  { %v1100_v20 = vpop.eup %1099  ;;  %v460_v21 = vmul.f32 1.0614054, %v1452_v16 }
 0x2f2   :  { %v462_v23 = vmul.f32 1.0614054, %v1100_v20  ;;  %v1102_v27 = vpop.eup %1101 }
 0x2f3   :  { %v466_v25 = vadd.f32 -1.4531521, %v460_v21  ;;  %v461_v1 = vmul.f32 1.0614054, %v1102_v27 }
 0x2f4   :  { %v468_v28 = vadd.f32 -1.4531521, %v462_v23 }
 0x2f5   :  { %v472_v31 = vmul.f32 %v1452_v16, %v466_v25  ;;  %v467_v37 = vadd.f32 -1.4531521, %v461_v1  ;;  %v1104_v38 = vpop.eup %1103 }
 0x2f6   :  { %v474_v33 = vmul.f32 %v1100_v20, %v468_v28  ;;  %v463_v49 = vmul.f32 1.0614054, %v1104_v38  ;;  %v1106_v54 = vpop.eup %1105 }
 0x2f7   :  { %v478_v35 = vadd.f32 1.4214138, %v472_v31  ;;  %v473_v48 = vmul.f32 %v1102_v27, %v467_v37  ;;  %v465_v62 = vmul.f32 1.0614054, %v1106_v54  ;;  %v1108_v5 = vpop.eup %1107 }
 0x2f8   :  { %v480_v39 = vadd.f32 1.4214138, %v474_v33  ;;  %v469_v58 = vadd.f32 -1.4531521, %v463_v49  ;;  %v464_v17 = vmul.f32 1.0614054, %v1108_v5  ;;  %v1110_v31 = vpop.eup %1109 }
 0x2f9   :  { %v484_v47 = vmul.f32 %v1452_v16, %v478_v35  ;;  %v479_v57 = vadd.f32 1.4214138, %v473_v48  ;;  %v471_v8 = vadd.f32 -1.4531521, %v465_v62 }
 0x2fa   :  { %v486_v52 = vmul.f32 %v1100_v20, %v480_v39  ;;  %v475_v4 = vmul.f32 %v1104_v38, %v469_v58  ;;  %v470_v9 = vadd.f32 -1.4531521, %v464_v17  ;;  %v1112_v39 = vpop.eup %1111  ;;  %v1146_v58 = vmov -1.0  }
 0x2fb   :  { %v490_v55 = vadd.f32 -0.28449672, %v484_v47  ;;  %v485_v0 = vmul.f32 %v1102_v27, %v479_v57  ;;  %v477_v15 = vmul.f32 %v1106_v54, %v471_v8  ;;  %v1114_v43 = vpop.eup %1113  ;;  %v430_v8 = vsel %vm424_vm3, 1.0, %v1146_v58 }
 0x2fc   :  { %v492_v60 = vadd.f32 -0.28449672, %v486_v52  ;;  %v481_v12 = vadd.f32 1.4214138, %v475_v4  ;;  %v476_v30 = vmul.f32 %v1108_v5, %v470_v9  ;;  %v1116_v48 = vpop.eup %1115 }
 0x2fd   :  { %v496_v10 = vmul.f32 %v1452_v16, %v490_v55  ;;  %v491_v11 = vadd.f32 -0.28449672, %v485_v0  ;;  %v483_v24 = vadd.f32 1.4214138, %v477_v15  ;;  %v435_v15 = vsel %vm429_vm6, 1.0, %v1146_v58 }
 0x2fe   :  { %v498_v7 = vmul.f32 %v1100_v20, %v492_v60  ;;  %v487_v22 = vmul.f32 %v1104_v38, %v481_v12  ;;  %v482_v35 = vadd.f32 1.4214138, %v476_v30 }
 0x2ff   :  { %v497_v21 = vmul.f32 %v1102_v27, %v491_v11  ;;  %v502_v25 = vadd.f32 0.2548296, %v496_v10  ;;  %v489_v29 = vmul.f32 %v1106_v54, %v483_v24  ;;  %v433_v10 = vsel %vm427_vm5, 1.0, %v1146_v58 }
 0x300   :  { %v504_v14 = vadd.f32 0.2548296, %v498_v7  ;;  %v493_v28 = vadd.f32 -0.28449672, %v487_v22  ;;  %v561_v22 = vmul.f32 0.5, %v1436_v59 }
 0x301   :  { %v503_v26 = vadd.f32 0.2548296, %v497_v21  ;;  %v495_v34 = vadd.f32 -0.28449672, %v489_v29  ;;  %v508_v36 = vmul.f32 %v1452_v16, %v502_v25  ;;  %v432_v16 = vsel %vm426_vm2, 1.0, %v1146_v58 }
 0x302   :  { %v510_v23 = vmul.f32 %v1100_v20, %v504_v14  ;;  %v499_v1 = vmul.f32 %v1104_v38, %v493_v28  ;;  %v488_v20 = vmul.f32 %v1108_v5, %v482_v35  ;;  %v431_v14 = vsel %vm425_vm4, 1.0, %v1146_v58 }
 0x303   :  { %v509_v33 = vmul.f32 %v1102_v27, %v503_v26  ;;  %v501_v42 = vmul.f32 %v1106_v54, %v495_v34  ;;  %v538_v55 = vmul.f32 %v1112_v39, %v508_v36  ;;  %v1118_v27 = vpop.eup %1117  ;;  %v558_v21 = vmul.f32 0.5, %v1418_v41 }
 0x304   :  { %v540_v32 = vmul.f32 %v1110_v31, %v510_v23  ;;  %v505_v37 = vadd.f32 0.2548296, %v499_v1  ;;  %v494_v53 = vadd.f32 -0.28449672, %v488_v20  ;;  %v1120_v12 = vpop.eup %1119  ;;  %v434_v25 = vsel %vm428_vm7, 1.0, %v1146_v58 }
 0x305   :  { %v539_v50 = vmul.f32 %v1114_v43, %v509_v33  ;;  %v507_v52 = vadd.f32 0.2548296, %v501_v42  ;;  %v544_v7 = vsub.f32 1.0, %v538_v55  ;;  %v557_v31 = vmul.f32 0.5, %v1426_v46 }
 0x306   :  { %v511_v47 = vmul.f32 %v1104_v38, %v505_v37  ;;  %v546_v49 = vsub.f32 1.0, %v540_v32  ;;  %v500_v62 = vmul.f32 %v1108_v5, %v494_v53  ;;  %v560_v32 = vmul.f32 0.5, %v1445_v3  ;;  %v909_v3 = vld [vmem:[%s1490_s9] ss:$0 sm:$0xff]  ;;  %s1121_s9 = scalar_lea.vmem %s868_s6, 256 }
 0x307   :  { %v513_v60 = vmul.f32 %v1106_v54, %v507_v52  ;;  %v545_v63 = vsub.f32 1.0, %v539_v50  ;;  %v550_v2 = vmul.f32 %v544_v7, %v430_v8  ;;  %v556_v41 = vmul.f32 0.5, %v1416_v40  ;;  %p1122_p0 = scmp.ne.s32.totalorder %s868_s6, %s1121_s9  ;;  %p1127_p2 = scmp.lt.s32.totalorder %s1121_s9, %s1121_s9 }
 0x308   :  { %v541_v57 = vmul.f32 %v1116_v48, %v511_v47  ;;  %v552_v38 = vmul.f32 %v546_v49, %v432_v16  ;;  %v506_v4 = vadd.f32 0.2548296, %v500_v62 }
 0x309   :  { %v543_v0 = vmul.f32 %v1118_v27, %v513_v60  ;;  %v551_v61 = vmul.f32 %v545_v63, %v431_v14  ;;  %v562_v30 = vadd.f32 1.0, %v550_v2  ;;  %p1128_p3 = por %p1127_p2, %p1126_p1 }
 0x30a   :  { %v547_v45 = vsub.f32 1.0, %v541_v57  ;;  %v512_v44 = vmul.f32 %v1108_v5, %v506_v4  ;;  %v564_v51 = vadd.f32 1.0, %v552_v38 }
 0x30b   :  { %v549_v11 = vsub.f32 1.0, %v543_v0  ;;  %v563_v26 = vadd.f32 1.0, %v551_v61  ;;  %v568_v36 = vmul.f32 %v562_v30, %v556_v41  ;;  %p1129_p4 = pnand %p1128_p3, %p1122_p0 }
 0x30c   :  { %v553_v54 = vmul.f32 %v547_v45, %v433_v10  ;;  %v542_v18 = vmul.f32 %v1120_v12, %v512_v44  ;;  %v570_v5 = vmul.f32 %v564_v51, %v558_v21 }
 0x30d   :  { %v555_v17 = vmul.f32 %v549_v11, %v435_v15  ;;  %v569_v34 = vmul.f32 %v563_v26, %v557_v31 }
 0x30e   :  { %v548_v24 = vsub.f32 1.0, %v542_v18  ;;  %v565_v9 = vadd.f32 1.0, %v553_v54 }
 0x30f   :  { %v567_v23 = vadd.f32 1.0, %v555_v17 }
 0x310   :  { %v554_v29 = vmul.f32 %v548_v24, %v434_v25  ;;  %v571_v59 = vmul.f32 %v565_v9, %v559_v6 }
 0x311   :  { %v573_v28 = vmul.f32 %v567_v23, %v561_v22 }
 0x312   :  { %v566_v33 = vadd.f32 1.0, %v554_v29  ;;  %v574_v39 = vpack.c.bf16 %v571_v59, %v568_v36 }
 0x313   :  { %v576_v1 = vpack.c.bf16 %v573_v28, %v570_v5 }
 0x314   :  { %v572_v35 = vmul.f32 %v566_v33, %v560_v32 }
 0x315   :  { %1028 = vmatmul.mubr.bf16.vlgmr.msra.gmra.mxu0 %v576_v1 }
 0x316   :  { %v575_v37 = vpack.c.bf16 %v572_v35, %v569_v34 }
 0x318   :  { %808 = vmatprep.mubr.bf16.mxu1 %v575_v37 }
 0x319   :  { %809 = vmatmul.mubr.bf16.vlgmr.msra.gmra.mxu1 %v574_v39 }
 0x3d5   :  { %v851_v42 = vpop.f32.mrf.mxu0 }
 0x3d7   :  { %v1029_v20 = vpop.f32.mrf.mxu0 }
 0x3d9   :  { %v854_v56 = vpop.f32.mrf.mxu0  ;;  %v964_v43 = vpop.f32.mrf.mxu1 }
 0x3db   :  { %v1030_v46 = vpop.f32.mrf.mxu0  ;;  %v965_v47 = vpop.f32.mrf.mxu1 }
 0x3dc   :  { %v966_v40 = vadd.f32 %v965_v47, %v964_v43 }
 0x3dd   :  { %v967_v48 = vpop.f32.mrf.mxu1 }
 0x3de   :  { %v811_v49 = vadd.f32 %v966_v40, %v909_v3 }
 0x3df   :  { %v968_v50 = vpop.f32.mrf.mxu1 }
 0x3e0   :  { %v852_v52 = vadd.f32 %v851_v42, %v811_v49  ;;  %v969_v53 = vadd.f32 %v968_v50, %v967_v48 }
 0x3e2   :  { %v858_v55 = vadd.f32 %v852_v52, %v1244_v13  ;;  %v814_v57 = vadd.f32 %v969_v53, %v909_v3 }
 0x3e4   :  { %860 = vst.msk [vmem:[#allocation2] sm:$0xff] %vm99_vm1, %v858_v55  ;;  %v855_v27 = vadd.f32 %v854_v56, %v814_v57 }
 0x3e6   :  { %v859_v58 = vadd.f32 %v855_v27, %v1251_v19 }
 0x3e8   :  { %861 = vst.msk [vmem:[#allocation2 + $0x8] sm:$0xff] %vm99_vm1, %v859_v58 }
 0x3e9   :  { %1132 = shalt.err (!%p1129_p4)
}
 0x3ea   :  { %s1148_s22 = smov 128   ;;  %s1149_s23 = smov 8  }
 0x3eb   :  { %873 = dma.vmem_to_hbm [thread:$0]  %s868_s6, 256, %s1491_s10, [#allocation3], %s1148_s22, %s1148_s22, %s1149_s23  }
 0x3ec   :  { %1141 = dma.done.wait [#allocation3], 256  }
 0x3ed   :  { %1142 = vsyncadd [#allocation3], 4294967040 }
 0x3ee   :  { %877 = vsyncpa [#allocation3], 1 }

</bundles_post_ra>
